<compile_context>
chip_gen: v5e
topology: v5e:2x2
jax: 0.10.0
libtpu: 0.0.40
codegen_flags: <defaults>
</compile_context>

<pallas_src>
import jax
import jax.numpy as jnp
from jax.experimental import pallas as pl
from jax.experimental.pallas import tpu as pltpu

LANE = 128      # vreg lane width
SUBLANE = 8     # f32 sublane height

MAX_BATCH_TILE = 1024                    # rows per grid step on the tiled path
GRIDLESS_VMEM_BUDGET = 8 * 1024 * 1024   # tensor bytes allowed on the gridless path
VMEM_LIMIT_BYTES = 40 * 1024 * 1024      # explicit scoped-VMEM limit (safe on v5e..v7x)


def _round_up(x, m):
    return (x + m - 1) // m * m


def mlp_policy_kernel(x_ref, w1_ref, b1_ref, w2_ref, b2_ref, o_ref):
    # First linear + ReLU. f32 operands, f32 accumulate, HIGHEST precision for
    # exact parity with the PyTorch module (default would use bf16 MXU passes).
    h = jnp.dot(x_ref[...], w1_ref[...],
                preferred_element_type=jnp.float32,
                precision=jax.lax.Precision.HIGHEST)
    h = jnp.maximum(h + b1_ref[...], 0.0)          # (Bt, H) + (1, H) broadcast
    # Second linear (lane-dense padded output width -> unmasked vst).
    out = jnp.dot(h, w2_ref[...],
                  preferred_element_type=jnp.float32,
                  precision=jax.lax.Precision.HIGHEST)
    o_ref[...] = (out + b2_ref[...]).astype(o_ref.dtype)


def _single_block_call(x, w1, b1, w2p, b2p):
    """Gridless call: whole arrays live in VMEM, no pipeline scaffolding."""
    B = x.shape[0]
    A_pad = w2p.shape[1]
    vmem = pltpu.MemorySpace.VMEM
    return pl.pallas_call(
        mlp_policy_kernel,
        out_shape=jax.ShapeDtypeStruct((B, A_pad), jnp.float32),
        in_specs=[
            pl.BlockSpec(memory_space=vmem),   # x
            pl.BlockSpec(memory_space=vmem),   # w1
            pl.BlockSpec(memory_space=vmem),   # b1
            pl.BlockSpec(memory_space=vmem),   # w2 (padded)
            pl.BlockSpec(memory_space=vmem),   # b2 (padded)
        ],
        out_specs=pl.BlockSpec(memory_space=vmem),
        compiler_params=pltpu.CompilerParams(
            vmem_limit_bytes=VMEM_LIMIT_BYTES),
    )(x, w1, b1, w2p, b2p)


def _tiled_call(x, w1, b1, w2p, b2p, tb, n_tiles):
    """Rollout-style path: tile the batch on a parallel grid axis; weights stay
    VMEM-resident (index_map returns (0, 0) every step)."""
    B, D_in = x.shape
    H = w1.shape[1]
    A_pad = w2p.shape[1]
    return pl.pallas_call(
        mlp_policy_kernel,
        out_shape=jax.ShapeDtypeStruct((B, A_pad), jnp.float32),
        grid=(n_tiles,),
        in_specs=[
            pl.BlockSpec((tb, D_in), lambda i: (i, 0)),
            pl.BlockSpec((D_in, H), lambda i: (0, 0)),
            pl.BlockSpec((1, H), lambda i: (0, 0)),
            pl.BlockSpec((H, A_pad), lambda i: (0, 0)),
            pl.BlockSpec((1, A_pad), lambda i: (0, 0)),
        ],
        out_specs=pl.BlockSpec((tb, A_pad), lambda i: (i, 0)),
        compiler_params=pltpu.CompilerParams(
            dimension_semantics=("parallel",),   # shards batch tiles across TCs on v7x
            vmem_limit_bytes=VMEM_LIMIT_BYTES,
        ),
    )(x, w1, b1, w2p, b2p)


def _gridless_bytes(B, D_in, H, A_pad):
    """f32 bytes the single-block path keeps in VMEM (x, h, out, weights)."""
    return 4 * (B * (D_in + H + A_pad) + D_in * H + H + H * A_pad + A_pad)


def _choose_batch_tiles(B):
    """Adaptive tile size: <= MAX_BATCH_TILE rows, multiple of SUBLANE, even
    tile count >= 2 so v7x's two TensorCores both get work; padding waste stays
    below one tile."""
    n_tiles = max(2, -(-B // MAX_BATCH_TILE))
    if n_tiles % 2:
        n_tiles += 1
    tb = _round_up(-(-B // n_tiles), SUBLANE)
    return tb, n_tiles


def prepare_params(w1, b1, w2, b2):
    """One-time parameter prep: lane-pad W2/b2 so the kernel's output width is
    a multiple of 128 (unmasked stores). Done once, not per forward call."""
    A = w2.shape[1]
    A_pad = max(_round_up(A, LANE), LANE)
    if A_pad != A:
        w2p = jnp.pad(w2, ((0, 0), (0, A_pad - A)))
        b2p = jnp.pad(b2, ((0, 0), (0, A_pad - A)))
    else:
        w2p, b2p = w2, b2
    return {"w1": w1, "b1": b1, "w2p": w2p, "b2p": b2p, "action_dim": A}


def mlp_policy_forward(x, params):
    """x: (B, input_size) f32. params: output of prepare_params.
    Returns (B, action_dim) f32."""
    w1, b1 = params["w1"], params["b1"]
    w2p, b2p = params["w2p"], params["b2p"]
    A = params["action_dim"]

    B, D_in = x.shape
    H = w1.shape[1]
    A_pad = w2p.shape[1]

    if _gridless_bytes(_round_up(B, SUBLANE), D_in, H, A_pad) <= GRIDLESS_VMEM_BUDGET:
        # Small / mid batch: gridless single-block kernel (no per-step overhead).
        B_pad = _round_up(B, SUBLANE)
        xp = jnp.pad(x, ((0, B_pad - B), (0, 0))) if B_pad != B else x
        out = _single_block_call(xp, w1, b1, w2p, b2p)
    else:
        # Large batch (vectorized envs / rollouts): adaptive batch tiles,
        # parallel grid axis, weights resident in VMEM across all steps.
        tb, n_tiles = _choose_batch_tiles(B)
        B_pad = tb * n_tiles
        xp = jnp.pad(x, ((0, B_pad - B), (0, 0))) if B_pad != B else x
        out = _tiled_call(xp, w1, b1, w2p, b2p, tb, n_tiles)

    return out[:B, :A]


def init_params(key, input_size, action_dim, hidden_units):
    """Deterministic init mimicking PyTorch nn.Linear defaults
    (uniform(-1/sqrt(fan_in), 1/sqrt(fan_in)) for weight and bias)."""
    k1, k2, k3, k4 = jax.random.split(key, 4)
    bound1 = 1.0 / jnp.sqrt(input_size)
    bound2 = 1.0 / jnp.sqrt(hidden_units)
    w1 = jax.random.uniform(k1, (input_size, hidden_units), jnp.float32,
                            -bound1, bound1)
    b1 = jax.random.uniform(k2, (1, hidden_units), jnp.float32, -bound1, bound1)
    w2 = jax.random.uniform(k3, (hidden_units, action_dim), jnp.float32,
                            -bound2, bound2)
    b2 = jax.random.uniform(k4, (1, action_dim), jnp.float32, -bound2, bound2)
    return w1, b1, w2, b2


if __name__ == "__main__":
    # Small shapes consistent with MLPPolicy(input_size, action_dim, hidden_units=512)
    B, input_size, action_dim, hidden_units = 8, 32, 16, 512

    key = jax.random.PRNGKey(0)
    kx, kp = jax.random.split(key)
    x = jax.random.normal(kx, (B, input_size), dtype=jnp.float32)
    w1, b1, w2, b2 = init_params(kp, input_size, action_dim, hidden_units)
    params = prepare_params(w1, b1, w2, b2)   # W2/b2 lane-padding hoisted here, once

    def ref_fn(xi):
        return jnp.maximum(xi @ w1 + b1, 0.0) @ w2 + b2

    # Small-batch (gridless, whole-arrays-in-VMEM) path.
    out = jax.block_until_ready(mlp_policy_forward(x, params))
    ref = ref_fn(x)
    assert out.shape == (B, action_dim)
    assert jnp.allclose(out, ref, atol=1e-5, rtol=1e-5)

    # Rollout-style large batch: exceeds the gridless VMEM budget, so it takes
    # the adaptive-tile parallel-grid path (>= 2 even tiles for v7x megacore).
    B_big = 4096
    xb = jax.random.normal(jax.random.PRNGKey(1), (B_big, input_size),
                           dtype=jnp.float32)
    out_b = jax.block_until_ready(mlp_policy_forward(xb, params))
    ref_b = ref_fn(xb)
    assert out_b.shape == (B_big, action_dim)
    assert jnp.allclose(out_b, ref_b, atol=1e-5, rtol=1e-5)

    print("KERNEL_OK")
</pallas_src>

<mosaic_0001>
module attributes {stable_mosaic.version = 11 : i64} {
  func.func @mlp_policy_kernel(%arg0: memref<8x32xf32, #tpu.memory_space<vmem>>, %arg1: memref<32x512xf32, #tpu.memory_space<vmem>>, %arg2: memref<1x512xf32, #tpu.memory_space<vmem>>, %arg3: memref<512x128xf32, #tpu.memory_space<vmem>>, %arg4: memref<1x128xf32, #tpu.memory_space<vmem>>, %arg5: memref<8x128xf32, #tpu.memory_space<vmem>>) attributes {dimension_semantics = [], scalar_prefetch = 0 : i64, scratch_operands = 0 : i64, tpu.core_type = #tpu.core_type<tc>} {
    %c0 = arith.constant 0 : index
    %c0_0 = arith.constant 0 : index
    %0 = vector.load %arg0[%c0, %c0_0] : memref<8x32xf32, #tpu.memory_space<vmem>>, vector<8x32xf32>
    %c0_1 = arith.constant 0 : index
    %c0_2 = arith.constant 0 : index
    %1 = vector.load %arg1[%c0_1, %c0_2] : memref<32x512xf32, #tpu.memory_space<vmem>>, vector<32x512xf32>
    %cst = arith.constant dense<0.000000e+00> : vector<8x512xf32>
    %2 = tpu.matmul %0, %1, %cst {dimension_numbers = #tpu.dot_dimension_numbers<[1], [0], [0], [1], [0, 0, 1, 1], [], []>, precision = #tpu.contract_precision<fp32>} : vector<8x32xf32>, vector<32x512xf32>, vector<8x512xf32> -> vector<8x512xf32>
    %c0_3 = arith.constant 0 : index
    %c0_4 = arith.constant 0 : index
    %3 = vector.load %arg2[%c0_3, %c0_4] : memref<1x512xf32, #tpu.memory_space<vmem>>, vector<1x512xf32>
    %4 = vector.broadcast %3 : vector<1x512xf32> to vector<8x512xf32>
    %5 = arith.addf %2, %4 : vector<8x512xf32>
    %cst_5 = arith.constant 0.000000e+00 : f32
    %6 = vector.broadcast %cst_5 : f32 to vector<8x512xf32>
    %7 = arith.maximumf %5, %6 : vector<8x512xf32>
    %c0_6 = arith.constant 0 : index
    %c0_7 = arith.constant 0 : index
    %8 = vector.load %arg3[%c0_6, %c0_7] : memref<512x128xf32, #tpu.memory_space<vmem>>, vector<512x128xf32>
    %cst_8 = arith.constant dense<0.000000e+00> : vector<8x128xf32>
    %9 = tpu.matmul %7, %8, %cst_8 {dimension_numbers = #tpu.dot_dimension_numbers<[1], [0], [0], [1], [0, 0, 1, 1], [], []>, precision = #tpu.contract_precision<fp32>} : vector<8x512xf32>, vector<512x128xf32>, vector<8x128xf32> -> vector<8x128xf32>
    %c0_9 = arith.constant 0 : index
    %c0_10 = arith.constant 0 : index
    %10 = vector.load %arg4[%c0_9, %c0_10] : memref<1x128xf32, #tpu.memory_space<vmem>>, vector<1x128xf32>
    %11 = vector.broadcast %10 : vector<1x128xf32> to vector<8x128xf32>
    %12 = arith.addf %9, %11 : vector<8x128xf32>
    %c0_11 = arith.constant 0 : index
    %c0_12 = arith.constant 0 : index
    %13 = vector.load %arg5[%c0_11, %c0_12] : memref<8x128xf32, #tpu.memory_space<vmem>>, vector<8x128xf32>
    tpu.vector_store %arg5[%c0_11, %c0_12], %12 {strides = array<i32>} : memref<8x128xf32, #tpu.memory_space<vmem>>, vector<8x128xf32>,
    return
  }
}

</mosaic_0001>

<bundles_post_ra>
// kernel: tpu_custom_call.1
= control target key start
LH: loop header
LB: loop body
LE: loop exit
PB: predicated region body
PF: predicated region fallthrough
CT: control target
= control target key end

     0   :  { %10 = vsyncpa [#allocation3], 0  ;;  %s3747_s0 = inlined_call_operand.hbm [shape: f32[8,32], index: 0, kind: input, shape index: {}]   ;;  %s3748_s1 = inlined_call_operand.hbm [shape: f32[32,512], index: 1, kind: input, shape index: {}]   ;;  %s3749_s2 = inlined_call_operand.hbm [shape: f32[1,512], index: 2, kind: input, shape index: {}]   ;;  %s3750_s3 = inlined_call_operand.hbm [shape: f32[512,128], index: 3, kind: input, shape index: {}]   ;;  %s3751_s4 = inlined_call_operand.vmem [shape: f32[1,128], index: 4, kind: input, shape index: {}]   ;;  %s3752_s5 = inlined_call_operand.hbm [shape: f32[8,128], index: 5, kind: output, shape index: {}]  }
   0x1   :  { %11 = vsyncpa [#allocation6], 0 }
   0x2   :  { %12 = vsyncpa [#allocation9], 0  ;;  %s29_s20 = sshll.u32 %s3748_s1, 4  ;;  %s30_s20 = int_to_ptr.hbm [resolvable:$true] %s29_s20 }
   0x3   :  { %13 = vsyncpa [#allocation4], 0  ;;  %s2445_s21 = smov [#allocation5]   ;;  %s19_s25 = sshll.u32 %s3747_s0, 4  ;;  %s20_s25 = int_to_ptr.hbm [resolvable:$true] %s19_s25 }
   0x4   :  { %s31_s22 = sshll.u32 %s2445_s21, 4  ;;  %s2446_s26 = smov 512   ;;  %s32_s22 = int_to_ptr.vmem [resolvable:$true] %s31_s22 }
   0x5   :  { %s2447_s27 = smov 32   ;;  %s2448_s28 = smov [#allocation2]  }
   0x6   :  { %37 = dma.hbm_to_vmem [thread:$0]  %s30_s20, 2048, %s32_s22, [#allocation6], %s2446_s26, %s2446_s26, %s2447_s27  }
   0x7   :  { %s21_s29 = sshll.u32 %s2448_s28, 4  ;;  %s43_s7 = sshll.u32 %s3749_s2, 4  ;;  %s22_s29 = int_to_ptr.vmem [resolvable:$true] %s21_s29  ;;  %s44_s7 = int_to_ptr.hbm [resolvable:$true] %s43_s7 }
   0x8   :  { %24 = dma.hbm_to_vmem [thread:$0]  %s20_s25, 128, %s22_s29, [#allocation3]  }
   0x9   :  { %s53_s9 = sshll.u32 %s3750_s3, 4  ;;  %s2449_s10 = smov [#allocation7]   ;;  %s54_s9 = int_to_ptr.hbm [resolvable:$true] %s53_s9 }
   0xa   :  { %s45_s11 = sshll.u32 %s2449_s10, 4  ;;  %s2450_s0 = smov [#allocation8]   ;;  %s46_s11 = int_to_ptr.vmem [resolvable:$true] %s45_s11 }
   0xb   :  { %48 = dma.hbm_to_vmem [thread:$0]  %s44_s7, 64, %s46_s11, [#allocation6]  }
   0xc   :  { %s55_s12 = sshll.u32 %s2450_s0, 4  ;;  %s2451_s13 = smov 128   ;;  %s56_s12 = int_to_ptr.vmem [resolvable:$true] %s55_s12 }
   0xd   :  { %s2452_s14 = smov 8  }
   0xe   :  { %61 = dma.hbm_to_vmem [thread:$0]  %s54_s9, 8192, %s56_s12, [#allocation9], %s2451_s13, %s2451_s13, %s2452_s14  }
   0xf   :  { %2437 = dma.done.wait [#allocation3], 128  }
  0x10   :  { %2438 = vsyncadd [#allocation3], 4294967168 }
  0x11   :  { %2439 = dma.done.wait [#allocation6], 2112  }
  0x12   :  { %2440 = vsyncadd [#allocation6], 4294965184 }
  0x13   :  { %2441 = dma.done.wait [#allocation9], 8192  }
  0x14   :  { %2442 = vsyncadd [#allocation9], 4294959104  ;;  %vm107_vm0 = vcmask 261120   ;;  %v93_v0 = vld [vmem:[#allocation5 + $0x60] sm:$0xff]  ;;  %v80_v7 = vld [vmem:[#allocation2] sm:$0xff]  ;;  %s2295_s18 = sshll.u32 %s3752_s5, 4  ;;  %s2296_s18 = int_to_ptr.hbm [resolvable:$true] %s2295_s18 }
  0x15   :  { %v89_v1 = vld [vmem:[#allocation5 + $0x40] sm:$0xff]  ;;  %v2496_v3 = vand.u32 4294901760, %v93_v0  ;;  %v94_v8 = vld [vmem:[#allocation5 + $0x68] sm:$0xff]  ;;  %v109_v10 = vsel %vm107_vm0, %v80_v7, 0  ;;  %v95_v52 = vld [vmem:[#allocation5 + $0x70] sm:$0xff] }
  0x16   :  { %v85_v2 = vld [vmem:[#allocation5 + $0x20] sm:$0xff]  ;;  %v2498_v4 = vand.u32 4294901760, %v89_v1  ;;  %v2504_v11 = vand.u32 4294901760, %v94_v8  ;;  %v90_v12 = vld [vmem:[#allocation5 + $0x48] sm:$0xff]  ;;  %v2513_v17 = vand.u32 4294901760, %v109_v10  ;;  %v91_v55 = vld [vmem:[#allocation5 + $0x50] sm:$0xff] }
  0x17   :  { %v2500_v5 = vand.u32 4294901760, %v85_v2  ;;  %v81_v6 = vld [vmem:[#allocation5] sm:$0xff]  ;;  %v86_v13 = vld [vmem:[#allocation5 + $0x28] sm:$0xff]  ;;  %v153_v14 = vsub.f32 %v93_v0, %v2496_v3  ;;  %124 = vmatpush.msra.mxu0 %v2496_v3  ;;  %224 = vmatpush.msra.mxu3 %v2496_v3  ;;  %v2518_v20 = vand.u32 4294901760, %v90_v12  ;;  %v2574_v56 = vand.u32 4294901760, %v95_v52  ;;  %v87_v59 = vld [vmem:[#allocation5 + $0x30] sm:$0xff] }
  0x18   :  { %v2502_v9 = vand.u32 4294901760, %v81_v6  ;;  %v159_v15 = vsub.f32 %v89_v1, %v2498_v4  ;;  %v82_v18 = vld [vmem:[#allocation5 + $0x8] sm:$0xff]  ;;  %v2521_v21 = vsub.f32 %v94_v8, %v2504_v11  ;;  %v2523_v22 = vand.u32 4294901760, %v86_v13  ;;  %v83_v61 = vld [vmem:[#allocation5 + $0x10] sm:$0xff]  ;;  %v96_v1 = vld [vmem:[#allocation5 + $0x78] sm:$0xff] }
  0x19   :  { %v2511_v16 = vsub.f32 %v85_v2, %v2500_v5  ;;  %195 = vmatpush.msra.mxu2 %v153_v14  ;;  %126 = vmatpush.msra.mxu0 %v2498_v4  ;;  %v154_v23 = vand.u32 4294901760, %v153_v14  ;;  %v2527_v25 = vsub.f32 %v109_v10, %v2513_v17  ;;  %v2534_v29 = vsub.f32 %v90_v12, %v2518_v20  ;;  %v88_v10 = vld [vmem:[#allocation5 + $0x38] sm:$0xff] }
  0x1a   :  { %v2516_v19 = vsub.f32 %v81_v6, %v2502_v9  ;;  %v160_v24 = vand.u32 4294901760, %v159_v15  ;;  %226 = vmatpush.msra.mxu3 %v2498_v4  ;;  %v339_v28 = vand.u32 4294901760, %v2521_v21  ;;  %v2536_v30 = vand.u32 4294901760, %v82_v18 }
  0x1b   :  { %v166_v26 = vand.u32 4294901760, %v2511_v16  ;;  %198 = vmatpush.msra.mxu2 %v159_v15  ;;  %v155_v31 = vsub.f32 %v153_v14, %v154_v23  ;;  %128 = vmatpush.msra.mxu0 %v2500_v5  ;;  %v2541_v34 = vand.u32 4294901760, %v2527_v25  ;;  %v345_v36 = vand.u32 4294901760, %v2534_v29  ;;  %v84_v14 = vld [vmem:[#allocation5 + $0x18] sm:$0xff] }
  0x1c   :  { %v172_v27 = vand.u32 4294901760, %v2516_v19  ;;  %v161_v32 = vsub.f32 %v159_v15, %v160_v24  ;;  %228 = vmatpush.msra.mxu3 %v2500_v5  ;;  %v340_v35 = vsub.f32 %v2521_v21, %v339_v28  ;;  %v2549_v37 = vsub.f32 %v86_v13, %v2523_v22 }
  0x1d   :  { %v167_v33 = vsub.f32 %v2511_v16, %v166_v26  ;;  %v156_v38 = vand.u32 4294901760, %v155_v31  ;;  %201 = vmatpush.msra.mxu2 %v2511_v16  ;;  %130 = vmatpush.msra.mxu0 %v2502_v9  ;;  %v134_v40 = vsub.f32 %v2527_v25, %v2541_v34  ;;  %v346_v43 = vsub.f32 %v2534_v29, %v345_v36 }
  0x1e   :  { %v162_v39 = vand.u32 4294901760, %v161_v32  ;;  %v173_v41 = vsub.f32 %v2516_v19, %v172_v27  ;;  %230 = vmatpush.msra.mxu3 %v2502_v9  ;;  %v341_v42 = vand.u32 4294901760, %v340_v35  ;;  %v351_v44 = vand.u32 4294901760, %v2549_v37  ;;  %v869_v35 = vld [vmem:[#allocation8 + $0x70] sm:$0xff] }
  0x1f   :  { %253 = vmatpush.msrb.mxu0 %v154_v23  ;;  %157 = vmatpush.msra.mxu1 %v156_v38  ;;  %v168_v45 = vand.u32 4294901760, %v167_v33  ;;  %v2560_v46 = vand.u32 4294901760, %v134_v40  ;;  %v2563_v47 = vsub.f32 %v82_v18, %v2536_v30  ;;  %v347_v48 = vand.u32 4294901760, %v346_v43  ;;  %v867_v43 = vld [vmem:[#allocation8 + $0x60] sm:$0xff] }
  0x20   :  { %204 = vmatpush.msra.mxu2 %v2516_v19  ;;  %234 = vmatmul.f32.vlgmr.msra.gmra.mxu3 %v2541_v34  ;;  %v352_v49 = vsub.f32 %v2549_v37, %v351_v44  ;;  %v174_v50 = vand.u32 4294901760, %v173_v41  ;;  %v2579_v58 = vand.u32 4294901760, %v91_v55  ;;  %v2584_v60 = vsub.f32 %v95_v52, %v2574_v56 }
  0x21   :  { %207 = vmatmul.f32.vlgmr.msra.gmra.mxu2 %v2527_v25  ;;  %163 = vmatpush.msra.mxu1 %v162_v39  ;;  %v357_v51 = vand.u32 4294901760, %v2563_v47  ;;  %v2588_v62 = vand.u32 4294901760, %v87_v59  ;;  %v2597_v0 = vand.u32 4294901760, %v83_v61  ;;  %v2609_v6 = vand.u32 4294901760, %v96_v1  ;;  %v868_v39 = vld [vmem:[#allocation8 + $0x68] sm:$0xff] }
  0x22   :  { %309 = vmatpush.msrb.mxu2 %v2504_v11  ;;  %136 = vmatmul.f32.vlgmr.msra.gmra.mxu0 %v2560_v46  ;;  %v353_v54 = vand.u32 4294901760, %v352_v49  ;;  %v2593_v63 = vsub.f32 %v91_v55, %v2579_v58  ;;  %v524_v2 = vand.u32 4294901760, %v2584_v60  ;;  %v2635_v16 = vand.u32 4294901760, %v88_v10  ;;  %v866_v49 = vld [vmem:[#allocation8 + $0x58] sm:$0xff] }
  0x23   :  { %342 = vmatpush.msrb.mxu3 %v341_v42  ;;  %169 = vmatpush.msra.mxu1 %v168_v45  ;;  %v358_v53 = vsub.f32 %v2563_v47, %v357_v51  ;;  %v2613_v7 = vsub.f32 %v83_v61, %v2597_v0  ;;  %v2630_v13 = vsub.f32 %v96_v1, %v2609_v6  ;;  %v2685_v41 = vand.u32 4294901760, %v869_v35 }
  0x24   :  { %311 = vmatpush.msrb.mxu2 %v2518_v20  ;;  %257 = vmatpush.msrb.mxu0 %v160_v24  ;;  %v525_v8 = vsub.f32 %v2584_v60, %v524_v2 }
  0x25   :  { %348 = vmatpush.msrb.mxu3 %v347_v48  ;;  %175 = vmatpush.msra.mxu1 %v174_v50  ;;  %v359_v57 = vand.u32 4294901760, %v358_v53  ;;  %v542_v15 = vand.u32 4294901760, %v2613_v7  ;;  %v709_v23 = vand.u32 4294901760, %v2630_v13  ;;  %v2707_v50 = vsub.f32 %v869_v35, %v2685_v41  ;;  %v865_v53 = vld [vmem:[#allocation8 + $0x50] sm:$0xff] }
  0x26   :  { %313 = vmatpush.msrb.mxu2 %v2523_v22  ;;  %177 = vmatmul.f32.vlgmr.msra.gmra.mxu1 %v2513_v17  ;;  %v526_v18 = vand.u32 4294901760, %v525_v8  ;;  %v2730_v61 = vand.u32 4294901760, %v865_v53  ;;  %v862_v8 = vld [vmem:[#allocation8 + $0x38] sm:$0xff] }
  0x27   :  { %261 = vmatpush.msrb.mxu0 %v166_v26  ;;  %284 = vmatpush.msrb.mxu1 %v2496_v3  ;;  %v2604_v3 = vsub.f32 %v87_v59, %v2588_v62  ;;  %v543_v24 = vsub.f32 %v2613_v7, %v542_v15  ;;  %v2658_v26 = vsub.f32 %v88_v10, %v2635_v16  ;;  %v864_v59 = vld [vmem:[#allocation8 + $0x48] sm:$0xff] }
  0x28   :  { %315 = vmatpush.msrb.mxu2 %v2536_v30  ;;  %354 = vmatpush.msrb.mxu3 %v353_v54  ;;  %v710_v31 = vsub.f32 %v2630_v13, %v709_v23 }
  0x29   :  { %321 = vmatmul.f32.vlgmr.msrb.gmra.mxu2 %v2560_v46  ;;  %286 = vmatpush.msrb.mxu1 %v2498_v4  ;;  %v92_v4 = vld [vmem:[#allocation5 + $0x58] sm:$0xff]  ;;  %v544_v32 = vand.u32 4294901760, %v543_v24  ;;  %v721_v33 = vand.u32 4294901760, %v2658_v26 }
  0x2a   :  { %265 = vmatpush.msrb.mxu0 %v172_v27  ;;  %360 = vmatpush.msrb.mxu3 %v359_v57  ;;  %v711_v40 = vand.u32 4294901760, %v710_v31 }
  0x2b   :  { %438 = vmatpush.msra.mxu2 %v339_v28  ;;  %288 = vmatpush.msrb.mxu1 %v2500_v5  ;;  %v530_v5 = vand.u32 4294901760, %v2593_v63  ;;  %v722_v42 = vsub.f32 %v2658_v26, %v721_v33 }
  0x2c   :  { %267 = vmatmul.f32.vlgmr.msrb.gmra.mxu0 %v2513_v17  ;;  %362 = vmatmul.f32.vlgmr.msrb.gmra.mxu3 %v2513_v17 }
  0x2d   :  { %380 = vmatpush.msra.mxu0 %v2521_v21  ;;  %290 = vmatpush.msrb.mxu1 %v2502_v9  ;;  %v2620_v9 = vand.u32 4294901760, %v92_v4  ;;  %v531_v12 = vsub.f32 %v2593_v63, %v530_v5  ;;  %v2647_v21 = vand.u32 4294901760, %v84_v14  ;;  %v723_v52 = vand.u32 4294901760, %v722_v42 }
  0x2e   :  { %442 = vmatpush.msra.mxu2 %v345_v36  ;;  %469 = vmatpush.msra.mxu3 %v2504_v11 }
  0x2f   :  { %292 = vmatmul.f32.vlgmr.msrb.gmra.mxu1 %v2513_v17  ;;  %383 = vmatpush.msra.mxu0 %v2534_v29  ;;  %v2640_v19 = vsub.f32 %v92_v4, %v2620_v9  ;;  %v2665_v29 = vsub.f32 %v84_v14, %v2647_v21  ;;  %v861_v14 = vld [vmem:[#allocation8 + $0x30] sm:$0xff] }
  0x30   :  { %409 = vmatpush.msra.mxu1 %v2504_v11  ;;  %446 = vmatpush.msra.mxu2 %v351_v44  ;;  %v536_v11 = vand.u32 4294901760, %v2604_v3 }
  0x31   :  { %471 = vmatpush.msra.mxu3 %v2518_v20  ;;  %386 = vmatpush.msra.mxu0 %v2549_v37  ;;  %v715_v27 = vand.u32 4294901760, %v2640_v19  ;;  %v727_v38 = vand.u32 4294901760, %v2665_v29 }
  0x32   :  { %411 = vmatpush.msra.mxu1 %v2518_v20  ;;  %450 = vmatpush.msra.mxu2 %v357_v51  ;;  %v537_v20 = vsub.f32 %v2604_v3, %v536_v11  ;;  %v2709_v51 = vand.u32 4294901760, %v867_v43 }
  0x33   :  { %473 = vmatpush.msra.mxu3 %v2523_v22  ;;  %452 = vmatmul.f32.vlgmr.msra.gmra.mxu2 %v2513_v17  ;;  %v716_v36 = vsub.f32 %v2640_v19, %v715_v27  ;;  %v728_v48 = vsub.f32 %v2665_v29, %v727_v38 }
  0x34   :  { %389 = vmatpush.msra.mxu0 %v2563_v47  ;;  %413 = vmatpush.msra.mxu1 %v2523_v22  ;;  %v532_v22 = vand.u32 4294901760, %v531_v12  ;;  %v538_v28 = vand.u32 4294901760, %v537_v20  ;;  %v2697_v47 = vand.u32 4294901760, %v868_v39 }
  0x35   :  { %475 = vmatpush.msra.mxu3 %v2536_v30  ;;  %392 = vmatmul.f32.vlgmr.msra.gmra.mxu0 %v2527_v25  ;;  %v717_v44 = vand.u32 4294901760, %v716_v36  ;;  %v729_v57 = vand.u32 4294901760, %v728_v48  ;;  %v856_v48 = vld [vmem:[#allocation8 + $0x8] sm:$0xff] }
  0x36   :  { %477 = vmatmul.f32.vlgmr.msra.gmra.mxu3 %v2513_v17  ;;  %415 = vmatpush.msra.mxu1 %v2536_v30  ;;  %v870_v30 = vld [vmem:[#allocation8 + $0x78] sm:$0xff]  ;;  %v2717_v55 = vsub.f32 %v868_v39, %v2697_v47  ;;  %v857_v39 = vld [vmem:[#allocation8 + $0x10] sm:$0xff] }
  0x37   :  { %565 = vmatpush.msrb.mxu2 %v2584_v60  ;;  %419 = vmatmul.f32.vlgmr.msra.gmra.mxu1 %v2541_v34  ;;  %v2679_v37 = vand.u32 4294901760, %v870_v30  ;;  %v2728_v60 = vsub.f32 %v867_v43, %v2709_v51 }
  0x38   :  { %494 = vmatpush.msrb.mxu0 %v2574_v56  ;;  %594 = vmatpush.msrb.mxu3 %v2574_v56  ;;  %v978_v1 = vand.u32 4294901760, %v2717_v55 }
  0x39   :  { %568 = vmatpush.msrb.mxu2 %v2593_v63  ;;  %527 = vmatpush.msrb.mxu1 %v526_v18  ;;  %v2695_v45 = vsub.f32 %v870_v30, %v2679_v37  ;;  %v863_v63 = vld [vmem:[#allocation8 + $0x40] sm:$0xff]  ;;  %v984_v4 = vand.u32 4294901760, %v2728_v60 }
  0x3a   :  { %496 = vmatpush.msrb.mxu0 %v2579_v58  ;;  %596 = vmatpush.msrb.mxu3 %v2579_v58  ;;  %v979_v10 = vsub.f32 %v2717_v55, %v978_v1 }
  0x3b   :  { %571 = vmatpush.msrb.mxu2 %v2604_v3  ;;  %533 = vmatpush.msrb.mxu1 %v532_v22  ;;  %v966_v54 = vand.u32 4294901760, %v2695_v45  ;;  %v2743_v3 = vand.u32 4294901760, %v864_v59  ;;  %v860_v22 = vld [vmem:[#allocation8 + $0x28] sm:$0xff] }
  0x3c   :  { %498 = vmatpush.msrb.mxu0 %v2588_v62  ;;  %598 = vmatpush.msrb.mxu3 %v2588_v62  ;;  %v2798_v30 = vand.u32 4294901760, %v860_v22 }
  0x3d   :  { %574 = vmatpush.msrb.mxu2 %v2613_v7  ;;  %539 = vmatpush.msrb.mxu1 %v538_v28  ;;  %v2756_v7 = vand.u32 4294901760, %v863_v63  ;;  %v2768_v12 = vsub.f32 %v864_v59, %v2743_v3 }
  0x3e   :  { %577 = vmatmul.f32.vlgmr.msrb.gmra.mxu2 %v2527_v25  ;;  %500 = vmatpush.msrb.mxu0 %v2597_v0 }
  0x3f   :  { %600 = vmatpush.msrb.mxu3 %v2597_v0  ;;  %506 = vmatmul.f32.vlgmr.msrb.gmra.mxu0 %v2560_v46  ;;  %v2782_v20 = vsub.f32 %v863_v63, %v2756_v7  ;;  %v1002_v24 = vand.u32 4294901760, %v2768_v12 }
  0x40   :  { %604 = vmatmul.f32.vlgmr.msrb.gmra.mxu3 %v2541_v34  ;;  %545 = vmatpush.msrb.mxu1 %v544_v32 }
  0x41   :  { %623 = vmatpush.msra.mxu0 %v524_v2  ;;  %547 = vmatmul.f32.vlgmr.msrb.gmra.mxu1 %v2513_v17  ;;  %v1008_v32 = vand.u32 4294901760, %v2782_v20 }
  0x42   :  { %679 = vmatpush.msra.mxu2 %v2609_v6  ;;  %654 = vmatpush.msra.mxu1 %v2574_v56  ;;  %v2719_v56 = vand.u32 4294901760, %v866_v49 }
  0x43   :  { %627 = vmatpush.msra.mxu0 %v530_v5  ;;  %712 = vmatpush.msra.mxu3 %v711_v40  ;;  %v2754_v5 = vsub.f32 %v865_v53, %v2730_v61  ;;  %v2820_v40 = vsub.f32 %v860_v22, %v2798_v30 }
  0x44   :  { %681 = vmatpush.msra.mxu2 %v2620_v9  ;;  %656 = vmatpush.msra.mxu1 %v2579_v58  ;;  %v972_v58 = vand.u32 4294901760, %v2707_v50  ;;  %v2741_v2 = vsub.f32 %v866_v49, %v2719_v56 }
  0x45   :  { %631 = vmatpush.msra.mxu0 %v536_v11  ;;  %718 = vmatpush.msra.mxu3 %v717_v44  ;;  %v996_v18 = vand.u32 4294901760, %v2754_v5  ;;  %v1009_v44 = vsub.f32 %v2782_v20, %v1008_v32  ;;  %v1026_v63 = vand.u32 4294901760, %v2820_v40 }
  0x46   :  { %683 = vmatpush.msra.mxu2 %v2635_v16  ;;  %658 = vmatpush.msra.mxu1 %v2588_v62  ;;  %v967_v62 = vsub.f32 %v2695_v45, %v966_v54  ;;  %v990_v11 = vand.u32 4294901760, %v2741_v2 }
  0x47   :  { %635 = vmatpush.msra.mxu0 %v542_v15  ;;  %724 = vmatpush.msra.mxu3 %v723_v52  ;;  %v985_v15 = vsub.f32 %v2728_v60, %v984_v4  ;;  %v997_v31 = vsub.f32 %v2754_v5, %v996_v18  ;;  %v2834_v52 = vand.u32 4294901760, %v857_v39 }
  0x48   :  { %637 = vmatmul.f32.vlgmr.msra.gmra.mxu0 %v2513_v17  ;;  %685 = vmatpush.msra.mxu2 %v2647_v21 }
  0x49   :  { %660 = vmatpush.msra.mxu1 %v2597_v0  ;;  %730 = vmatpush.msra.mxu3 %v729_v57  ;;  %v973_v0 = vsub.f32 %v2707_v50, %v972_v58  ;;  %v998_v43 = vand.u32 4294901760, %v997_v31  ;;  %v855_v57 = vld [vmem:[#allocation8] sm:$0xff] }
  0x4a   :  { %662 = vmatmul.f32.vlgmr.msra.gmra.mxu1 %v2513_v17  ;;  %808 = vmatpush.msrb.mxu2 %v709_v23  ;;  %v991_v23 = vsub.f32 %v2741_v2, %v990_v11 }
  0x4b   :  { %779 = vmatpush.msrb.mxu1 %v2609_v6  ;;  %839 = vmatpush.msrb.mxu3 %v2609_v6  ;;  %v968_v6 = vand.u32 4294901760, %v967_v62 }
  0x4c   :  { %812 = vmatpush.msrb.mxu2 %v715_v27  ;;  %750 = vmatpush.msrb.mxu0 %v2630_v13  ;;  %v2772_v13 = vand.u32 4294901760, %v862_v8  ;;  %v859_v27 = vld [vmem:[#allocation8 + $0x20] sm:$0xff]  ;;  %v992_v36 = vand.u32 4294901760, %v991_v23 }
  0x4d   :  { %781 = vmatpush.msrb.mxu1 %v2620_v9  ;;  %841 = vmatpush.msrb.mxu3 %v2620_v9  ;;  %v974_v9 = vand.u32 4294901760, %v973_v0  ;;  %v2810_v35 = vand.u32 4294901760, %v859_v27  ;;  %v2846_v0 = vand.u32 4294901760, %v856_v48 }
  0x4e   :  { %816 = vmatpush.msrb.mxu2 %v721_v33  ;;  %753 = vmatpush.msrb.mxu0 %v2640_v19  ;;  %v2796_v28 = vsub.f32 %v862_v8, %v2772_v13  ;;  %v986_v19 = vand.u32 4294901760, %v985_v15  ;;  %v858_v33 = vld [vmem:[#allocation8 + $0x18] sm:$0xff]  ;;  %v1010_v8 = vand.u32 4294901760, %v1009_v44 }
  0x4f   :  { %783 = vmatpush.msrb.mxu1 %v2635_v16  ;;  %691 = vmatmul.f32.vlgmr.msra.gmra.mxu2 %v2560_v46  ;;  %v2786_v46 = vand.u32 4294901760, %v861_v14  ;;  %v2822_v42 = vand.u32 4294901760, %v858_v33  ;;  %v2832_v49 = vsub.f32 %v859_v27, %v2810_v35  ;;  %v2868_v22 = vsub.f32 %v856_v48, %v2846_v0 }
  0x50   :  { %820 = vmatpush.msrb.mxu2 %v727_v38  ;;  %843 = vmatpush.msrb.mxu3 %v2635_v16  ;;  %v980_v16 = vand.u32 4294901760, %v979_v10  ;;  %v1003_v38 = vsub.f32 %v2768_v12, %v1002_v24 }
  0x51   :  { %785 = vmatpush.msrb.mxu1 %v2647_v21  ;;  %732 = vmatmul.f32.vlgmr.msra.gmra.mxu3 %v2513_v17  ;;  %v2844_v62 = vsub.f32 %v858_v33, %v2822_v42  ;;  %v1032_v10 = vand.u32 4294901760, %v2832_v49 }
  0x52   :  { %1067 = vmatpush.msra.mxu2 %v2695_v45  ;;  %845 = vmatpush.msrb.mxu3 %v2647_v21  ;;  %v2808_v21 = vsub.f32 %v861_v14, %v2786_v46  ;;  %v1004_v53 = vand.u32 4294901760, %v1003_v38  ;;  %v2856_v14 = vsub.f32 %v857_v39, %v2834_v52  ;;  %v3754_v38 = vand.u32 4294901760, %v2868_v22 }
  0x53   :  { %969 = vmatpush.msra.mxu1 %v968_v6  ;;  %756 = vmatpush.msrb.mxu0 %v2658_v26  ;;  %v1014_v26 = vand.u32 4294901760, %v2796_v28  ;;  %v1038_v15 = vand.u32 4294901760, %v2844_v62  ;;  %v1033_v27 = vsub.f32 %v2832_v49, %v1032_v10 }
  0x54   :  { %1070 = vmatpush.msra.mxu2 %v2707_v50  ;;  %1120 = vmatpush.msra.mxu3 %v2679_v37 }
  0x55   :  { %975 = vmatpush.msra.mxu1 %v974_v9  ;;  %759 = vmatpush.msrb.mxu0 %v2665_v29  ;;  %v1020_v29 = vand.u32 4294901760, %v2808_v21  ;;  %v1015_v59 = vsub.f32 %v2796_v28, %v1014_v26  ;;  %v2858_v9 = vand.u32 4294901760, %v855_v57 }
  0x56   :  { %1073 = vmatpush.msra.mxu2 %v2717_v55  ;;  %1122 = vmatpush.msra.mxu3 %v2685_v41 }
  0x57   :  { %981 = vmatpush.msra.mxu1 %v980_v16  ;;  %924 = vmatpush.msra.mxu0 %v2679_v37  ;;  %v1021_v6 = vsub.f32 %v2808_v21, %v1020_v29  ;;  %v886_v16 = vld [vmem:[#allocation8 + $0xf8] sm:$0xff]  ;;  %v2878_v31 = vsub.f32 %v855_v57, %v2858_v9  ;;  %v884_v57 = vld [vmem:[#allocation8 + $0xe8] sm:$0xff] }
  0x58   :  { %1076 = vmatpush.msra.mxu2 %v2728_v60  ;;  %1124 = vmatpush.msra.mxu3 %v2697_v47  ;;  %v2887_v39 = vand.u32 4294901760, %v886_v16 }
  0x59   :  { %987 = vmatpush.msra.mxu1 %v986_v19  ;;  %822 = vmatmul.f32.vlgmr.msrb.gmra.mxu2 %v2513_v17  ;;  %v1022_v23 = vand.u32 4294901760, %v1021_v6  ;;  %v1044_v19 = vand.u32 4294901760, %v2856_v14  ;;  %v3753_v48 = vand.u32 4294901760, %v2878_v31 }
  0x5a   :  { %926 = vmatpush.msra.mxu0 %v2685_v41  ;;  %1079 = vmatpush.msra.mxu2 %v2741_v2  ;;  %v2905_v6 = vsub.f32 %v886_v16, %v2887_v39  ;;  %v882_v16 = vld [vmem:[#allocation8 + $0xd8] sm:$0xff] }
  0x5b   :  { %993 = vmatpush.msra.mxu1 %v992_v36  ;;  %1126 = vmatpush.msra.mxu3 %v2709_v51  ;;  %v1039_v36 = vsub.f32 %v2844_v62, %v1038_v15  ;;  %v1045_v44 = vsub.f32 %v2856_v14, %v1044_v19 }
  0x5c   :  { %762 = vmatmul.f32.vlgmr.msrb.gmra.mxu0 %v2527_v25  ;;  %847 = vmatmul.f32.vlgmr.msrb.gmra.mxu3 %v2513_v17  ;;  %v1016_v25 = vand.u32 4294901760, %v1015_v59  ;;  %v1027_v17 = vsub.f32 %v2820_v40, %v1026_v63 }
  0x5d   :  { %999 = vmatpush.msra.mxu1 %v998_v43  ;;  %928 = vmatpush.msra.mxu0 %v2697_v47  ;;  %v1034_v43 = vand.u32 4294901760, %v1033_v27  ;;  %v1040_v59 = vand.u32 4294901760, %v1039_v36  ;;  %v1057_v27 = vsub.f32 %v2878_v31, %v3753_v48  ;;  %v2929_v48 = vand.u32 4294901760, %v882_v16 }
  0x5e   :  { %1082 = vmatpush.msra.mxu2 %v2754_v5  ;;  %1128 = vmatpush.msra.mxu3 %v2719_v56  ;;  %v1028_v33 = vand.u32 4294901760, %v1027_v17  ;;  %v2909_v17 = vand.u32 4294901760, %v884_v57 }
  0x5f   :  { %1005 = vmatpush.msra.mxu1 %v1004_v53  ;;  %930 = vmatpush.msra.mxu0 %v2709_v51 }
  0x60   :  { %789 = vmatmul.f32.vlgmr.msrb.gmra.mxu1 %v2541_v34  ;;  %1085 = vmatpush.msra.mxu2 %v2768_v12  ;;  %v885_v34 = vld [vmem:[#allocation8 + $0xf0] sm:$0xff] }
  0x61   :  { %1011 = vmatpush.msra.mxu1 %v1010_v8  ;;  %1130 = vmatpush.msra.mxu3 %v2730_v61  ;;  %v2896_v53 = vand.u32 4294901760, %v885_v34  ;;  %v1051_v8 = vsub.f32 %v2868_v22, %v3754_v38  ;;  %v1058_v38 = vand.u32 4294901760, %v1057_v27  ;;  %v2946_v27 = vsub.f32 %v882_v16, %v2929_v48  ;;  %v881_v16 = vld [vmem:[#allocation8 + $0xd0] sm:$0xff] }
  0x62   :  { %932 = vmatpush.msra.mxu0 %v2719_v56  ;;  %1088 = vmatpush.msra.mxu2 %v2782_v20 }
  0x63   :  { %1017 = vmatpush.msra.mxu1 %v1016_v25  ;;  %1132 = vmatpush.msra.mxu3 %v2743_v3  ;;  %v883_v25 = vld [vmem:[#allocation8 + $0xe0] sm:$0xff] }
  0x64   :  { %934 = vmatpush.msra.mxu0 %v2730_v61  ;;  %1091 = vmatpush.msra.mxu2 %v2796_v28  ;;  %v2920_v36 = vand.u32 4294901760, %v883_v25 }
  0x65   :  { %1023 = vmatpush.msra.mxu1 %v1022_v23  ;;  %1134 = vmatpush.msra.mxu3 %v2756_v7  ;;  %v1046_v23 = vand.u32 4294901760, %v1045_v44  ;;  %v3755_v44 = vand.u32 4294901760, %v2905_v6 }
  0x66   :  { %936 = vmatpush.msra.mxu0 %v2743_v3  ;;  %1094 = vmatpush.msra.mxu2 %v2808_v21 }
  0x67   :  { %1029 = vmatpush.msra.mxu1 %v1028_v33  ;;  %1136 = vmatpush.msra.mxu3 %v2772_v13  ;;  %v2916_v33 = vsub.f32 %v885_v34, %v2896_v53  ;;  %v2927_v34 = vsub.f32 %v884_v57, %v2909_v17  ;;  %v1308_v57 = vsub.f32 %v2905_v6, %v3755_v44 }
  0x68   :  { %938 = vmatpush.msra.mxu0 %v2756_v7  ;;  %1097 = vmatpush.msra.mxu2 %v2820_v40 }
  0x69   :  { %1035 = vmatpush.msra.mxu1 %v1034_v43  ;;  %1138 = vmatpush.msra.mxu3 %v2786_v46  ;;  %v1052_v43 = vand.u32 4294901760, %v1051_v8  ;;  %v2936_v8 = vsub.f32 %v883_v25, %v2920_v36  ;;  %v1309_v44 = vand.u32 4294901760, %v1308_v57  ;;  %v2971_v57 = vand.u32 4294901760, %v881_v16 }
  0x6a   :  { %940 = vmatpush.msra.mxu0 %v2772_v13  ;;  %1100 = vmatpush.msra.mxu2 %v2832_v49 }
  0x6b   :  { %1041 = vmatpush.msra.mxu1 %v1040_v59  ;;  %1140 = vmatpush.msra.mxu3 %v2798_v30  ;;  %v3756_v59 = vand.u32 4294901760, %v2916_v33 }
  0x6c   :  { %942 = vmatpush.msra.mxu0 %v2786_v46  ;;  %1103 = vmatpush.msra.mxu2 %v2844_v62  ;;  %v3787_v62 = vand.u32 4294901760, %v2878_v31 }
  0x6d   :  { %1047 = vmatpush.msra.mxu1 %v1046_v23  ;;  %1142 = vmatpush.msra.mxu3 %v2810_v35  ;;  %v3757_v23 = vand.u32 4294901760, %v2927_v34  ;;  %v1314_v25 = vsub.f32 %v2916_v33, %v3756_v59  ;;  %v3758_v59 = vand.u32 4294901760, %v2946_v27 }
  0x6e   :  { %944 = vmatpush.msra.mxu0 %v2798_v30  ;;  %1106 = vmatpush.msra.mxu2 %v2856_v14 }
  0x6f   :  { %1053 = vmatpush.msra.mxu1 %v1052_v43  ;;  %1144 = vmatpush.msra.mxu3 %v2822_v42  ;;  %v1325_v43 = vand.u32 4294901760, %v2936_v8 }
  0x70   :  { %946 = vmatpush.msra.mxu0 %v2810_v35  ;;  %1109 = vmatpush.msra.mxu2 %v2868_v22 }
  0x71   :  { %1059 = vmatpush.msra.mxu1 %v1058_v38  ;;  %1146 = vmatpush.msra.mxu3 %v2834_v52  ;;  %v1320_v38 = vsub.f32 %v2927_v34, %v3757_v23 }
  0x72   :  { %948 = vmatpush.msra.mxu0 %v2822_v42  ;;  %1112 = vmatpush.msra.mxu2 %v2878_v31 }
  0x73   :  { %1228 = vmatpush.msrb.mxu1 %v2679_v37  ;;  %1148 = vmatpush.msra.mxu3 %v2846_v0  ;;  %v1315_v37 = vand.u32 4294901760, %v1314_v25  ;;  %v1321_v23 = vand.u32 4294901760, %v1320_v38  ;;  %v1332_v25 = vsub.f32 %v2946_v27, %v3758_v59  ;;  %v2987_v38 = vsub.f32 %v881_v16, %v2971_v57  ;;  %v879_v59 = vld [vmem:[#allocation8 + $0xc0] sm:$0xff] }
  0x74   :  { %1265 = vmatpush.msrb.mxu2 %v2887_v39  ;;  %950 = vmatpush.msra.mxu0 %v2834_v52 }
  0x75   :  { %1230 = vmatpush.msrb.mxu1 %v2685_v41  ;;  %1150 = vmatpush.msra.mxu3 %v2858_v9  ;;  %v1326_v41 = vsub.f32 %v2936_v8, %v1325_v43  ;;  %v1337_v45 = vand.u32 4294901760, %v2987_v38 }
  0x76   :  { %1267 = vmatpush.msrb.mxu2 %v2896_v53  ;;  %952 = vmatpush.msra.mxu0 %v2846_v0 }
  0x77   :  { %1232 = vmatpush.msrb.mxu1 %v2697_v47  ;;  %1310 = vmatpush.msrb.mxu3 %v1309_v44  ;;  %v1327_v47 = vand.u32 4294901760, %v1326_v41  ;;  %v880_v44 = vld [vmem:[#allocation8 + $0xc8] sm:$0xff]  ;;  %v1338_v50 = vsub.f32 %v2987_v38, %v1337_v45 }
  0x78   :  { %1269 = vmatpush.msrb.mxu2 %v2909_v17  ;;  %954 = vmatpush.msra.mxu0 %v2858_v9 }
  0x79   :  { %1234 = vmatpush.msrb.mxu1 %v2709_v51  ;;  %1316 = vmatpush.msrb.mxu3 %v1315_v37  ;;  %v2984_v51 = vand.u32 4294901760, %v880_v44  ;;  %v1333_v37 = vand.u32 4294901760, %v1332_v25  ;;  %v1339_v55 = vand.u32 4294901760, %v1338_v50 }
  0x7a   :  { %1161 = vmatpush.msrb.mxu0 %v966_v54  ;;  %1271 = vmatpush.msrb.mxu2 %v2920_v36  ;;  %v2994_v54 = vand.u32 4294901760, %v879_v59 }
  0x7b   :  { %1236 = vmatpush.msrb.mxu1 %v2719_v56  ;;  %1322 = vmatpush.msrb.mxu3 %v1321_v23  ;;  %v2997_v56 = vsub.f32 %v880_v44, %v2984_v51  ;;  %v878_v23 = vld [vmem:[#allocation8 + $0xb8] sm:$0xff] }
  0x7c   :  { %1165 = vmatpush.msrb.mxu0 %v972_v58  ;;  %1273 = vmatpush.msrb.mxu2 %v2929_v48  ;;  %v3010_v16 = vsub.f32 %v879_v59, %v2994_v54 }
  0x7d   :  { %1238 = vmatpush.msrb.mxu1 %v2730_v61  ;;  %1328 = vmatpush.msrb.mxu3 %v1327_v47  ;;  %v1343_v58 = vand.u32 4294901760, %v2997_v56  ;;  %v3007_v61 = vand.u32 4294901760, %v878_v23 }
  0x7e   :  { %1169 = vmatpush.msrb.mxu0 %v978_v1  ;;  %1275 = vmatpush.msrb.mxu2 %v2971_v57  ;;  %v1349_v41 = vand.u32 4294901760, %v3010_v16 }
  0x7f   :  { %1240 = vmatpush.msrb.mxu1 %v2743_v3  ;;  %1334 = vmatpush.msrb.mxu3 %v1333_v37  ;;  %v877_v3 = vld [vmem:[#allocation8 + $0xb0] sm:$0xff]  ;;  %v1344_v1 = vsub.f32 %v2997_v56, %v1343_v58  ;;  %v3024_v59 = vsub.f32 %v878_v23, %v3007_v61  ;;  %v875_v37 = vld [vmem:[#allocation8 + $0xa0] sm:$0xff] }
  0x80   :  { %1173 = vmatpush.msrb.mxu0 %v984_v4  ;;  %1277 = vmatpush.msrb.mxu2 %v2984_v51  ;;  %v3020_v25 = vand.u32 4294901760, %v877_v3  ;;  %v1350_v4 = vsub.f32 %v3010_v16, %v1349_v41  ;;  %v3042_v23 = vand.u32 4294901760, %v875_v37 }
  0x81   :  { %1242 = vmatpush.msrb.mxu1 %v2756_v7  ;;  %v876_v7 = vld [vmem:[#allocation8 + $0xa8] sm:$0xff]  ;;  %1340 = vmatpush.msrb.mxu3 %v1339_v55  ;;  %v1345_v60 = vand.u32 4294901760, %v1344_v1 }
  0x82   :  { %1177 = vmatpush.msrb.mxu0 %v990_v11  ;;  %v3031_v47 = vand.u32 4294901760, %v876_v7  ;;  %v3034_v44 = vsub.f32 %v877_v3, %v3020_v25  ;;  %1279 = vmatpush.msrb.mxu2 %v2994_v54  ;;  %v1351_v2 = vand.u32 4294901760, %v1350_v4  ;;  %v874_v3 = vld [vmem:[#allocation8 + $0x98] sm:$0xff]  ;;  %v3061_v1 = vsub.f32 %v875_v37, %v3042_v23 }
  0x83   :  { %1244 = vmatpush.msrb.mxu1 %v2772_v13  ;;  %v1355_v13 = vand.u32 4294901760, %v3024_v59  ;;  %1346 = vmatpush.msrb.mxu3 %v1345_v60  ;;  %v3058_v55 = vand.u32 4294901760, %v874_v3 }
  0x84   :  { %1181 = vmatpush.msrb.mxu0 %v996_v18  ;;  %v1361_v11 = vand.u32 4294901760, %v3034_v44  ;;  %v3045_v50 = vsub.f32 %v876_v7, %v3031_v47  ;;  %1281 = vmatpush.msrb.mxu2 %v3007_v61  ;;  %v873_v7 = vld [vmem:[#allocation8 + $0x90] sm:$0xff]  ;;  %v1373_v60 = vand.u32 4294901760, %v3061_v1 }
  0x85   :  { %1246 = vmatpush.msrb.mxu1 %v2786_v46  ;;  %v1356_v46 = vsub.f32 %v3024_v59, %v1355_v13  ;;  %1352 = vmatpush.msrb.mxu3 %v1351_v2  ;;  %v3071_v4 = vand.u32 4294901760, %v873_v7  ;;  %v3075_v37 = vsub.f32 %v874_v3, %v3058_v55 }
  0x86   :  { %1185 = vmatpush.msrb.mxu0 %v1002_v24  ;;  %v1362_v5 = vsub.f32 %v3034_v44, %v1361_v11  ;;  %v1367_v18 = vand.u32 4294901760, %v3045_v50  ;;  %1283 = vmatpush.msrb.mxu2 %v3020_v25 }
  0x87   :  { %1248 = vmatpush.msrb.mxu1 %v2798_v30  ;;  %v1357_v30 = vand.u32 4294901760, %v1356_v46  ;;  %v3086_v46 = vsub.f32 %v873_v7, %v3071_v4  ;;  %v1379_v3 = vand.u32 4294901760, %v3075_v37 }
  0x88   :  { %1189 = vmatpush.msrb.mxu0 %v1008_v32  ;;  %v1363_v12 = vand.u32 4294901760, %v1362_v5  ;;  %v1368_v24 = vsub.f32 %v3045_v50, %v1367_v18  ;;  %1285 = vmatpush.msrb.mxu2 %v3031_v47  ;;  %v1374_v32 = vsub.f32 %v3061_v1, %v1373_v60  ;;  %v871_v5 = vld [vmem:[#allocation8 + $0x80] sm:$0xff] }
  0x89   :  { %1250 = vmatpush.msrb.mxu1 %v2810_v35  ;;  %1358 = vmatpush.msrb.mxu3 %v1357_v30  ;;  %v872_v35 = vld [vmem:[#allocation8 + $0x88] sm:$0xff]  ;;  %v1380_v7 = vsub.f32 %v3075_v37, %v1379_v3 }
  0x8a   :  { %1193 = vmatpush.msrb.mxu0 %v1014_v26  ;;  %v1369_v20 = vand.u32 4294901760, %v1368_v24  ;;  %v3083_v2 = vand.u32 4294901760, %v872_v35  ;;  %1287 = vmatpush.msrb.mxu2 %v3042_v23  ;;  %v1375_v28 = vand.u32 4294901760, %v1374_v32  ;;  %v1385_v26 = vand.u32 4294901760, %v3086_v46 }
  0x8b   :  { %1252 = vmatpush.msrb.mxu1 %v2822_v42  ;;  %1364 = vmatpush.msrb.mxu3 %v1363_v12  ;;  %v3094_v42 = vand.u32 4294901760, %v871_v5  ;;  %v1381_v12 = vand.u32 4294901760, %v1380_v7 }
  0x8c   :  { %1197 = vmatpush.msrb.mxu0 %v1020_v29  ;;  %v3097_v30 = vsub.f32 %v872_v35, %v3083_v2  ;;  %1289 = vmatpush.msrb.mxu2 %v3058_v55  ;;  %v1386_v21 = vsub.f32 %v3086_v46, %v1385_v26 }
  0x8d   :  { %1254 = vmatpush.msrb.mxu1 %v2834_v52  ;;  %1370 = vmatpush.msrb.mxu3 %v1369_v20  ;;  %v3111_v52 = vsub.f32 %v871_v5, %v3094_v42 }
  0x8e   :  { %1201 = vmatpush.msrb.mxu0 %v1026_v63  ;;  %v3760_v29 = vand.u32 4294901760, %v3097_v30  ;;  %1291 = vmatpush.msrb.mxu2 %v3071_v4  ;;  %v1387_v40 = vand.u32 4294901760, %v1386_v21 }
  0x8f   :  { %1256 = vmatpush.msrb.mxu1 %v2846_v0  ;;  %1376 = vmatpush.msrb.mxu3 %v1375_v28  ;;  %v3759_v0 = vand.u32 4294901760, %v3111_v52 }
  0x90   :  { %1205 = vmatpush.msrb.mxu0 %v1032_v10  ;;  %v1392_v63 = vsub.f32 %v3097_v30, %v3760_v29  ;;  %1293 = vmatpush.msrb.mxu2 %v3083_v2 }
  0x91   :  { %1258 = vmatpush.msrb.mxu1 %v2858_v9  ;;  %1382 = vmatpush.msrb.mxu3 %v1381_v12  ;;  %v1398_v49 = vsub.f32 %v3111_v52, %v3759_v0  ;;  %v3786_v9 = vand.u32 4294901760, %v2868_v22 }
  0x92   :  { %1209 = vmatpush.msrb.mxu0 %v1038_v15  ;;  %v1393_v24 = vand.u32 4294901760, %v1392_v63  ;;  %1295 = vmatpush.msrb.mxu2 %v3094_v42  ;;  %v3134_v15 = vld [vmem:[#allocation7] sm:$0xf] }
  0x93   :  { %1388 = vmatpush.msrb.mxu3 %v1387_v40  ;;  %v1399_v10 = vand.u32 4294901760, %v1398_v49  ;;  %v99_v35 = vperm.slane %v3134_v15, 0  ;;  %v100_v22 = vperm.slane %v3134_v15, 1 }
  0x94   :  { %1213 = vmatpush.msrb.mxu0 %v1044_v19 }
  0x95   :  { %1394 = vmatpush.msrb.mxu3 %v1393_v24 }
  0x96   :  { %1217 = vmatpush.msrb.mxu0 %v3786_v9 }
  0x97   :  { %1400 = vmatpush.msrb.mxu3 %v1399_v10 }
  0x98   :  { %1221 = vmatpush.msrb.mxu0 %v3787_v62 }
  0x9f   :  { %v137_v20 = vpop.f32.mrf.mxu0 }
  0xa0   :  { %v138_v32 = vadd.f32 %v137_v20, %v99_v35 }
  0xa3   :  { %v178_v5 = vpop.f32.mrf.mxu1  ;;  %v235_v14 = vpop.f32.mrf.mxu3 }
  0xa4   :  { %v208_v28 = vpop.f32.mrf.mxu2  ;;  %v179_v7 = vadd.f32 %v178_v5, %v138_v32 }
  0xa6   :  { %v209_v19 = vadd.f32 %v208_v28, %v179_v7  ;;  %v3788_v7 = vand.u32 4294901760, %v2905_v6 }
  0xa8   :  { %v236_v21 = vadd.f32 %v235_v14, %v209_v19 }
  0xa9   :  { %v268_v12 = vpop.f32.mrf.mxu0 }
  0xaa   :  { %v269_v40 = vadd.f32 %v268_v12, %v236_v21  ;;  %v3789_v12 = vand.u32 4294901760, %v2916_v33 }
  0xac   :  { %v293_v63 = vpop.f32.mrf.mxu1  ;;  %v322_v24 = vpop.f32.mrf.mxu2 }
  0xad   :  { %v294_v31 = vadd.f32 %v293_v63, %v269_v40  ;;  %v323_v49 = vadd.f32 %v322_v24, %v100_v22  ;;  %v3790_v63 = vand.u32 4294901760, %v2927_v34 }
  0xaf   :  { %v851_v10 = vmax.f32 %v294_v31, 0.0  ;;  %v363_v9 = vpop.f32.mrf.mxu3  ;;  %v896_v31 = vld [vmem:[#allocation8 + $0x148] sm:$0xff] }
  0xb0   :  { %v364_v0 = vadd.f32 %v363_v9, %v323_v49  ;;  %v895_v9 = vld [vmem:[#allocation8 + $0x140] sm:$0xff] }
  0xb1   :  { %v955_v62 = vand.u32 4294901760, %v851_v10 }
  0xb2   :  { %v393_v35 = vpop.f32.mrf.mxu0 }
  0xb3   :  { %v956_v29 = vsub.f32 %v851_v10, %v955_v62  ;;  %1061 = vmatmul.f32.vlgmr.msra.gmra.mxu1 %v955_v62  ;;  %v394_v20 = vadd.f32 %v393_v35, %v364_v0 }
  0xb4   :  { %1461 = vmatpush.msra.mxu1 %v2887_v39  ;;  %v420_v5 = vpop.f32.mrf.mxu1 }
  0xb5   :  { %v957_v32 = vand.u32 4294901760, %v956_v29  ;;  %1115 = vmatmul.f32.vlgmr.msra.gmra.mxu2 %v956_v29  ;;  %v421_v28 = vadd.f32 %v420_v5, %v394_v20  ;;  %v3250_v20 = vand.u32 4294901760, %v895_v9 }
  0xb6   :  { %1463 = vmatpush.msra.mxu1 %v2896_v53  ;;  %1502 = vmatpush.msra.mxu2 %v3788_v7  ;;  %v453_v19 = vpop.f32.mrf.mxu2  ;;  %v893_v7 = vld [vmem:[#allocation8 + $0x130] sm:$0xff] }
  0xb7   :  { %v958_v14 = vsub.f32 %v956_v29, %v957_v32  ;;  %1154 = vmatmul.f32.vlgmr.msra.gmra.mxu3 %v957_v32  ;;  %v454_v21 = vadd.f32 %v453_v19, %v421_v28  ;;  %v894_v32 = vld [vmem:[#allocation8 + $0x138] sm:$0xff] }
  0xb8   :  { %1465 = vmatpush.msra.mxu1 %v2909_v17  ;;  %1506 = vmatpush.msra.mxu2 %v3789_v12 }
  0xb9   :  { %1569 = vmatpush.msra.mxu3 %v2887_v39  ;;  %v478_v0 = vpop.f32.mrf.mxu3  ;;  %v959_v22 = vand.u32 4294901760, %v958_v14  ;;  %v3269_v14 = vand.u32 4294901760, %v894_v32 }
  0xba   :  { %v479_v40 = vadd.f32 %v478_v0, %v454_v21  ;;  %1467 = vmatpush.msra.mxu1 %v2920_v36  ;;  %1510 = vmatpush.msra.mxu2 %v3790_v63  ;;  %v3278_v21 = vsub.f32 %v895_v9, %v3250_v20  ;;  %v892_v0 = vld [vmem:[#allocation8 + $0x128] sm:$0xff] }
  0xbb   :  { %1571 = vmatpush.msra.mxu3 %v2896_v53  ;;  %960 = vmatmul.f32.vlgmr.msra.gmra.mxu0 %v959_v22  ;;  %v3791_v53 = vand.u32 4294901760, %v2946_v27 }
  0xbc   :  { %v852_v29 = vmax.f32 %v479_v40, 0.0  ;;  %1260 = vmatmul.f32.vlgmr.msrb.gmra.mxu1 %v955_v62  ;;  %1408 = vmatpush.msra.mxu0 %v2905_v6  ;;  %v902_v6 = vld [vmem:[#allocation8 + $0x178] sm:$0xff]  ;;  %v507_v10 = vpop.f32.mrf.mxu0  ;;  %v3284_v40 = vand.u32 4294901760, %v893_v7 }
  0xbd   :  { %1469 = vmatpush.msra.mxu1 %v2929_v48  ;;  %1514 = vmatpush.msra.mxu2 %v1325_v43  ;;  %v900_v43 = vld [vmem:[#allocation8 + $0x168] sm:$0xff] }
  0xbe   :  { %v3154_v39 = vand.u32 4294901760, %v852_v29  ;;  %1573 = vmatpush.msra.mxu3 %v2909_v17  ;;  %1411 = vmatpush.msra.mxu0 %v2916_v33  ;;  %v901_v33 = vld [vmem:[#allocation8 + $0x170] sm:$0xff] }
  0xbf   :  { %1471 = vmatpush.msra.mxu1 %v2971_v57  ;;  %1518 = vmatpush.msra.mxu2 %v3791_v53 }
  0xc0   :  { %v3162_v24 = vsub.f32 %v852_v29, %v3154_v39  ;;  %1575 = vmatpush.msra.mxu3 %v2920_v36  ;;  %1414 = vmatpush.msra.mxu0 %v2927_v34  ;;  %v3175_v36 = vand.u32 4294901760, %v902_v6 }
  0xc1   :  { %1473 = vmatpush.msra.mxu1 %v2984_v51  ;;  %1522 = vmatpush.msra.mxu2 %v1337_v45  ;;  %v899_v45 = vld [vmem:[#allocation8 + $0x160] sm:$0xff]  ;;  %v578_v22 = vpop.f32.mrf.mxu2 }
  0xc2   :  { %v1298_v17 = vand.u32 4294901760, %v3162_v24  ;;  %1577 = vmatpush.msra.mxu3 %v2929_v48  ;;  %1417 = vmatpush.msra.mxu0 %v2936_v8  ;;  %v3183_v48 = vand.u32 4294901760, %v901_v33 }
  0xc3   :  { %1475 = vmatpush.msra.mxu1 %v2994_v54  ;;  %1526 = vmatpush.msra.mxu2 %v1343_v58  ;;  %v3193_v58 = vand.u32 4294901760, %v900_v43 }
  0xc4   :  { %v1299_v34 = vsub.f32 %v3162_v24, %v1298_v17  ;;  %1579 = vmatpush.msra.mxu3 %v2971_v57  ;;  %1223 = vmatmul.f32.vlgmr.msrb.gmra.mxu0 %v955_v62  ;;  %v3191_v57 = vsub.f32 %v902_v6, %v3175_v36  ;;  %v891_v6 = vld [vmem:[#allocation8 + $0x120] sm:$0xff] }
  0xc5   :  { %1420 = vmatpush.msra.mxu0 %v2946_v27  ;;  %1477 = vmatpush.msra.mxu1 %v3007_v61  ;;  %v898_v27 = vld [vmem:[#allocation8 + $0x158] sm:$0xff] }
  0xc6   :  { %1530 = vmatpush.msra.mxu2 %v1349_v41  ;;  %1581 = vmatpush.msra.mxu3 %v2984_v51  ;;  %v1300_v8 = vand.u32 4294901760, %v1299_v34  ;;  %v3200_v51 = vsub.f32 %v901_v33, %v3183_v48  ;;  %v3211_v41 = vsub.f32 %v900_v43, %v3193_v58  ;;  %v3769_v34 = vand.u32 4294901760, %v3278_v21 }
  0xc7   :  { %1423 = vmatpush.msra.mxu0 %v2987_v38  ;;  %1479 = vmatpush.msra.mxu1 %v3020_v25  ;;  %v3202_v38 = vand.u32 4294901760, %v899_v45 }
  0xc8   :  { %1534 = vmatpush.msra.mxu2 %v1355_v13  ;;  %1583 = vmatpush.msra.mxu3 %v2994_v54  ;;  %v3778_v54 = vand.u32 4294901760, %v3191_v57  ;;  %v897_v13 = vld [vmem:[#allocation8 + $0x150] sm:$0xff] }
  0xc9   :  { %1301 = vmatmul.f32.vlgmr.msrb.gmra.mxu2 %v1300_v8  ;;  %1426 = vmatpush.msra.mxu0 %v2997_v56  ;;  %v3213_v56 = vand.u32 4294901760, %v898_v27  ;;  %v3227_v49 = vand.u32 4294901760, %v897_v13  ;;  %v890_v8 = vld [vmem:[#allocation8 + $0x118] sm:$0xff] }
  0xca   :  { %1481 = vmatpush.msra.mxu1 %v3031_v47  ;;  %1538 = vmatpush.msra.mxu2 %v1361_v11  ;;  %v101_v11 = vperm.slane %v3134_v15, 2  ;;  %v3321_v9 = vand.u32 4294901760, %v890_v8 }
  0xcb   :  { %1585 = vmatpush.msra.mxu3 %v3007_v61  ;;  %1429 = vmatpush.msra.mxu0 %v3010_v16  ;;  %v3777_v61 = vand.u32 4294901760, %v3200_v51  ;;  %v3222_v16 = vsub.f32 %v899_v45, %v3202_v38  ;;  %v3237_v62 = vsub.f32 %v898_v27, %v3213_v56  ;;  %v3307_v45 = vsub.f32 %v893_v7, %v3284_v40  ;;  %v605_v27 = vpop.f32.mrf.mxu3  ;;  %v887_v7 = vld [vmem:[#allocation8 + $0x100] sm:$0xff] }
  0xcc   :  { %1402 = vmatmul.f32.vlgmr.msrb.gmra.mxu3 %v3154_v39  ;;  %1483 = vmatpush.msra.mxu1 %v3042_v23  ;;  %v508_v35 = vadd.f32 %v507_v10, %v101_v11  ;;  %v889_v11 = vld [vmem:[#allocation8 + $0x110] sm:$0xff] }
  0xcd   :  { %1542 = vmatpush.msra.mxu2 %v1367_v18  ;;  %1587 = vmatpush.msra.mxu3 %v3020_v25  ;;  %v1649_v25 = vsub.f32 %v3191_v57, %v3778_v54  ;;  %v3776_v18 = vand.u32 4294901760, %v3211_v41  ;;  %v3774_v28 = vand.u32 4294901760, %v3237_v62 }
  0xce   :  { %1432 = vmatpush.msra.mxu0 %v3024_v59  ;;  %1485 = vmatpush.msra.mxu1 %v3058_v55  ;;  %v3239_v59 = vand.u32 4294901760, %v896_v31 }
  0xcf   :  { %1546 = vmatpush.msra.mxu2 %v1373_v60  ;;  %1589 = vmatpush.msra.mxu3 %v3031_v47  ;;  %v1655_v47 = vsub.f32 %v3200_v51, %v3777_v61  ;;  %v3775_v60 = vand.u32 4294901760, %v3222_v16  ;;  %v1661_v5 = vsub.f32 %v3211_v41, %v3776_v18  ;;  %v1673_v29 = vsub.f32 %v3237_v62, %v3774_v28  ;;  %v909_v18 = vld [vmem:[#allocation8 + $0x1b0] sm:$0xff] }
  0xd0   :  { %1435 = vmatpush.msra.mxu0 %v3034_v44  ;;  %1487 = vmatpush.msra.mxu1 %v3071_v4  ;;  %v3255_v44 = vsub.f32 %v897_v13, %v3227_v49  ;;  %v3309_v13 = vand.u32 4294901760, %v891_v6 }
  0xd1   :  { %1550 = vmatpush.msra.mxu2 %v1379_v3  ;;  %1591 = vmatpush.msra.mxu3 %v3042_v23  ;;  %v548_v3 = vpop.f32.mrf.mxu1  ;;  %v1650_v23 = vand.u32 4294901760, %v1649_v25  ;;  %v1667_v19 = vsub.f32 %v3222_v16, %v3775_v60  ;;  %v1662_v63 = vand.u32 4294901760, %v1661_v5  ;;  %v3333_v5 = vand.u32 4294901760, %v889_v11 }
  0xd2   :  { %1438 = vmatpush.msra.mxu0 %v3045_v50  ;;  %1489 = vmatpush.msra.mxu1 %v3083_v2  ;;  %v3265_v50 = vsub.f32 %v896_v31, %v3239_v59  ;;  %v549_v12 = vadd.f32 %v548_v3, %v508_v35  ;;  %v1674_v31 = vand.u32 4294901760, %v1673_v29  ;;  %v638_v3 = vpop.f32.mrf.mxu0  ;;  %v3357_v29 = vand.u32 4294901760, %v887_v7 }
  0xd3   :  { %1554 = vmatpush.msra.mxu2 %v1385_v26  ;;  %1593 = vmatpush.msra.mxu3 %v3058_v55  ;;  %v3792_v26 = vand.u32 4294901760, %v3097_v30  ;;  %v1656_v55 = vand.u32 4294901760, %v1655_v47  ;;  %v1668_v33 = vand.u32 4294901760, %v1667_v19  ;;  %v888_v47 = vld [vmem:[#allocation8 + $0x108] sm:$0xff]  ;;  %v3343_v19 = vsub.f32 %v890_v8, %v3321_v9 }
  0xd4   :  { %1441 = vmatpush.msra.mxu0 %v3061_v1  ;;  %1491 = vmatpush.msra.mxu1 %v3094_v42  ;;  %v3771_v1 = vand.u32 4294901760, %v3255_v44  ;;  %v3770_v53 = vand.u32 4294901760, %v3265_v50  ;;  %v579_v43 = vadd.f32 %v578_v22, %v549_v12  ;;  %v3345_v12 = vand.u32 4294901760, %v888_v47 }
  0xd5   :  { %1558 = vmatpush.msra.mxu2 %v3792_v26  ;;  %1595 = vmatpush.msra.mxu3 %v3071_v4  ;;  %v3793_v4 = vand.u32 4294901760, %v3111_v52 }
  0xd6   :  { %1495 = vmatmul.f32.vlgmr.msra.gmra.mxu1 %v1298_v17  ;;  %1444 = vmatpush.msra.mxu0 %v3075_v37  ;;  %v3295_v37 = vsub.f32 %v894_v32, %v3269_v14  ;;  %v3297_v17 = vand.u32 4294901760, %v892_v0  ;;  %v606_v25 = vadd.f32 %v605_v27, %v579_v43  ;;  %v3767_v32 = vand.u32 4294901760, %v3307_v45 }
  0xd7   :  { %1651 = vmatpush.msrb.mxu1 %v1650_v23  ;;  %1562 = vmatpush.msra.mxu2 %v3793_v4  ;;  %v3331_v23 = vsub.f32 %v891_v6, %v3309_v13  ;;  %v3763_v43 = vand.u32 4294901760, %v3343_v19  ;;  %v3367_v8 = vsub.f32 %v888_v47, %v3345_v12 }
  0xd8   :  { %1597 = vmatpush.msra.mxu3 %v3083_v2  ;;  %1564 = vmatmul.f32.vlgmr.msra.gmra.mxu2 %v3154_v39  ;;  %v1679_v2 = vsub.f32 %v3255_v44, %v3771_v1  ;;  %v3319_v10 = vsub.f32 %v892_v0, %v3297_v17  ;;  %v639_v0 = vadd.f32 %v638_v3, %v606_v25  ;;  %v917_v3 = vld [vmem:[#allocation8 + $0x1f0] sm:$0xff] }
  0xd9   :  { %1657 = vmatpush.msrb.mxu1 %v1656_v55  ;;  %1749 = vmatpush.msrb.mxu2 %v3191_v57  ;;  %v3764_v22 = vand.u32 4294901760, %v3331_v23  ;;  %v663_v4 = vpop.f32.mrf.mxu1  ;;  %3794 = vst [vmem:[#allocation15_spill] sm:$0xff] %v3367_v8  ;;  %v1721_v47 = vsub.f32 %v3343_v19, %v3763_v43 }
  0xda   :  { %1447 = vmatpush.msra.mxu0 %v3086_v46  ;;  %1599 = vmatpush.msra.mxu3 %v3094_v42  ;;  %v1685_v46 = vsub.f32 %v3265_v50, %v3770_v53  ;;  %v3768_v42 = vand.u32 4294901760, %v3295_v37  ;;  %v1680_v35 = vand.u32 4294901760, %v1679_v2  ;;  %v3765_v55 = vand.u32 4294901760, %v3319_v10  ;;  %v911_v53 = vld [vmem:[#allocation8 + $0x1c0] sm:$0xff] }
  0xdb   :  { %1601 = vmatmul.f32.vlgmr.msra.gmra.mxu3 %v3154_v39  ;;  %1663 = vmatpush.msrb.mxu1 %v1662_v63  ;;  %v1691_v39 = vsub.f32 %v3278_v21, %v3769_v34  ;;  %v3355_v63 = vsub.f32 %v889_v11, %v3333_v5  ;;  %v664_v2 = vadd.f32 %v663_v4, %v639_v0  ;;  %v3398_v4 = vand.u32 4294901760, %v917_v3  ;;  %v912_v34 = vld [vmem:[#allocation8 + $0x1c8] sm:$0xff] }
  0xdc   :  { %1752 = vmatpush.msrb.mxu2 %v3200_v51  ;;  %1802 = vmatpush.msrb.mxu3 %v3175_v36  ;;  %v1697_v26 = vsub.f32 %v3295_v37, %v3768_v42  ;;  %v3377_v11 = vsub.f32 %v887_v7, %v3357_v29  ;;  %v763_v42 = vpop.f32.mrf.mxu0  ;;  %v3473_v60 = vand.u32 4294901760, %v911_v53 }
  0xdd   :  { %1450 = vmatpush.msra.mxu0 %v3097_v30  ;;  %1669 = vmatpush.msrb.mxu1 %v1668_v33  ;;  %v1686_v30 = vand.u32 4294901760, %v1685_v46  ;;  %v1709_v33 = vsub.f32 %v3319_v10, %v3765_v55  ;;  %v3761_v46 = vand.u32 4294901760, %v3355_v63 }
  0xde   :  { %1755 = vmatpush.msrb.mxu2 %v3211_v41  ;;  %1804 = vmatpush.msrb.mxu3 %v3183_v48  ;;  %v1698_v6 = vand.u32 4294901760, %v1697_v26  ;;  %3795 = vst [vmem:[#allocation16_spill] sm:$0xff] %v3377_v11  ;;  %v3766_v0 = vand.u32 4294901760, %v3377_v11 }
  0xdf   :  { %1453 = vmatpush.msra.mxu0 %v3111_v52  ;;  %1675 = vmatpush.msrb.mxu1 %v1674_v31  ;;  %v1692_v52 = vand.u32 4294901760, %v1691_v39  ;;  %v1715_v31 = vsub.f32 %v3331_v23, %v3764_v22  ;;  %v918_v39 = vld [vmem:[#allocation8 + $0x1f8] sm:$0xff]  ;;  %v1710_v25 = vand.u32 4294901760, %v1709_v33  ;;  %v1722_v33 = vand.u32 4294901760, %v1721_v47 }
  0xe0   :  { %1456 = vmatmul.f32.vlgmr.msra.gmra.mxu0 %v3162_v24  ;;  %1758 = vmatpush.msrb.mxu2 %v3222_v16  ;;  %v1703_v24 = vsub.f32 %v3307_v45, %v3767_v32  ;;  %v3388_v7 = vand.u32 4294901760, %v918_v39  ;;  %v1739_v47 = vsub.f32 %v3377_v11, %v3766_v0  ;;  %v3420_v22 = vsub.f32 %v917_v3, %v3398_v4  ;;  %v913_v0 = vld [vmem:[#allocation8 + $0x1d0] sm:$0xff] }
  0xe1   :  { %1606 = vmatpush.msrb.mxu0 %v3175_v36  ;;  %1806 = vmatpush.msrb.mxu3 %v3193_v58  ;;  %v1716_v26 = vand.u32 4294901760, %v1715_v31 }
  0xe2   :  { %1681 = vmatpush.msrb.mxu1 %v1680_v35  ;;  %1761 = vmatpush.msrb.mxu2 %v3237_v62  ;;  %v1704_v27 = vand.u32 4294901760, %v1703_v24  ;;  %v3762_v35 = vand.u32 4294901760, %v3367_v8  ;;  %v102_v24 = vperm.slane %v3134_v15, 3  ;;  %v3409_v31 = vsub.f32 %v918_v39, %v3388_v7  ;;  %v914_v39 = vld [vmem:[#allocation8 + $0x1d8] sm:$0xff] }
  0xe3   :  { %1608 = vmatpush.msrb.mxu0 %v3183_v48  ;;  %1808 = vmatpush.msrb.mxu3 %v3202_v38  ;;  %v1740_v3 = vand.u32 4294901760, %v1739_v47 }
  0xe4   :  { %1687 = vmatpush.msrb.mxu1 %v1686_v30  ;;  %1764 = vmatpush.msrb.mxu2 %v3255_v44  ;;  %v853_v30 = vmax.f32 %v664_v2, 0.0  ;;  %v1733_v2 = vsub.f32 %v3367_v8, %v3762_v35 }
  0xe5   :  { %1610 = vmatpush.msrb.mxu0 %v3193_v58  ;;  %1810 = vmatpush.msrb.mxu3 %v3213_v56 }
  0xe6   :  { %1693 = vmatpush.msrb.mxu1 %v1692_v52  ;;  %1767 = vmatpush.msrb.mxu2 %v3265_v50  ;;  %v1727_v52 = vsub.f32 %v3355_v63, %v3761_v46  ;;  %v3406_v15 = vand.u32 4294901760, %v853_v30  ;;  %v915_v46 = vld [vmem:[#allocation8 + $0x1e0] sm:$0xff] }
  0xe7   :  { %1612 = vmatpush.msrb.mxu0 %v3202_v38  ;;  %1812 = vmatpush.msrb.mxu3 %v3227_v49 }
  0xe8   :  { %1699 = vmatpush.msrb.mxu1 %v1698_v6  ;;  %1770 = vmatpush.msrb.mxu2 %v3278_v21  ;;  %v692_v6 = vpop.f32.mrf.mxu2  ;;  %v3424_v55 = vsub.f32 %v853_v30, %v3406_v15  ;;  %v3773_v30 = vand.u32 4294901760, %v3420_v22 }
  0xe9   :  { %1614 = vmatpush.msrb.mxu0 %v3213_v56  ;;  %1814 = vmatpush.msrb.mxu3 %v3239_v59  ;;  %v693_v35 = vadd.f32 %v692_v6, %v102_v24  ;;  %v3772_v24 = vand.u32 4294901760, %v3409_v31  ;;  %v3429_v6 = vand.u32 4294901760, %v915_v46 }
  0xea   :  { %1705 = vmatpush.msrb.mxu1 %v1704_v27  ;;  %1773 = vmatpush.msrb.mxu2 %v3295_v37  ;;  %v916_v27 = vld [vmem:[#allocation8 + $0x1e8] sm:$0xff]  ;;  %v1639_v47 = vand.u32 4294901760, %v3424_v55  ;;  %v1996_v1 = vsub.f32 %v3420_v22, %v3773_v30 }
  0xeb   :  { %1616 = vmatpush.msrb.mxu0 %v3227_v49  ;;  %1816 = vmatpush.msrb.mxu3 %v3250_v20  ;;  %v3417_v43 = vand.u32 4294901760, %v916_v27 }
  0xec   :  { %1711 = vmatpush.msrb.mxu1 %v1710_v25  ;;  %1776 = vmatpush.msrb.mxu2 %v3307_v45  ;;  %v1728_v25 = vand.u32 4294901760, %v1727_v52  ;;  %v1734_v52 = vand.u32 4294901760, %v1733_v2  ;;  %v1997_v61 = vand.u32 4294901760, %v1996_v1 }
  0xed   :  { %1618 = vmatpush.msrb.mxu0 %v3239_v59  ;;  %1818 = vmatpush.msrb.mxu3 %v3269_v14  ;;  %v3438_v2 = vsub.f32 %v916_v27, %v3417_v43  ;;  %v3450_v27 = vsub.f32 %v915_v46, %v3429_v6  ;;  %v3462_v46 = vand.u32 4294901760, %v912_v34 }
  0xee   :  { %1717 = vmatpush.msrb.mxu1 %v1716_v26  ;;  %1779 = vmatpush.msrb.mxu2 %v3319_v10  ;;  %v733_v26 = vpop.f32.mrf.mxu3 }
  0xef   :  { %1620 = vmatpush.msrb.mxu0 %v3250_v20  ;;  %1820 = vmatpush.msrb.mxu3 %v3284_v40  ;;  %v734_v32 = vadd.f32 %v733_v26, %v693_v35  ;;  %3796 = vst [vmem:[#allocation17_spill] sm:$0xff] %v3438_v2  ;;  %v1990_v35 = vsub.f32 %v3409_v31, %v3772_v24  ;;  %v3779_v24 = vand.u32 4294901760, %v3438_v2 }
  0xf0   :  { %1723 = vmatpush.msrb.mxu1 %v1722_v33  ;;  %1782 = vmatpush.msrb.mxu2 %v3331_v23  ;;  %v3432_v33 = vand.u32 4294901760, %v914_v39  ;;  %3797 = vst [vmem:[#allocation18_spill] sm:$0xff] %v3450_v27  ;;  %v3484_v54 = vsub.f32 %v912_v34, %v3462_v46  ;;  %v823_v28 = vpop.f32.mrf.mxu2  ;;  %v3496_v34 = vsub.f32 %v911_v53, %v3473_v60 }
  0xf1   :  { %1622 = vmatpush.msrb.mxu0 %v3269_v14  ;;  %1822 = vmatpush.msrb.mxu3 %v3297_v17  ;;  %v1991_v30 = vand.u32 4294901760, %v1990_v35  ;;  %v2002_v35 = vsub.f32 %v3438_v2, %v3779_v24  ;;  %v907_v2 = vld [vmem:[#allocation8 + $0x1a0] sm:$0xff] }
  0xf2   :  { %1729 = vmatpush.msrb.mxu1 %v1728_v25  ;;  %1785 = vmatpush.msrb.mxu2 %v3343_v19  ;;  %v3441_v25 = vand.u32 4294901760, %v913_v0  ;;  %v3454_v26 = vsub.f32 %v914_v39, %v3432_v33  ;;  %v1640_v39 = vsub.f32 %v3424_v55, %v1639_v47 }
  0xf3   :  { %1624 = vmatpush.msrb.mxu0 %v3284_v40  ;;  %1824 = vmatpush.msrb.mxu3 %v3309_v13 }
  0xf4   :  { %1735 = vmatpush.msrb.mxu1 %v1734_v52  ;;  %1788 = vmatpush.msrb.mxu2 %v3355_v63  ;;  %v764_v52 = vadd.f32 %v763_v42, %v734_v32  ;;  %v3467_v42 = vsub.f32 %v913_v0, %v3441_v25  ;;  %v910_v32 = vld [vmem:[#allocation8 + $0x1b8] sm:$0xff]  ;;  %v1641_v1 = vand.u32 4294901760, %v1640_v39  ;;  %v2003_v39 = vand.u32 4294901760, %v2002_v35 }
  0xf5   :  { %1626 = vmatpush.msrb.mxu0 %v3297_v17  ;;  %1826 = vmatpush.msrb.mxu3 %v3321_v9 }
  0xf6   :  { %1741 = vmatpush.msrb.mxu1 %v1740_v3  ;;  %1791 = vmatpush.msrb.mxu2 %v3367_v8  ;;  %v790_v3 = vpop.f32.mrf.mxu1  ;;  %v848_v53 = vpop.f32.mrf.mxu3 }
  0xf7   :  { %1628 = vmatpush.msrb.mxu0 %v3309_v13  ;;  %1828 = vmatpush.msrb.mxu3 %v3333_v5  ;;  %v791_v0 = vadd.f32 %v790_v3, %v764_v52  ;;  %v908_v3 = vld [vmem:[#allocation8 + $0x1a8] sm:$0xff] }
  0xf8   :  { %1910 = vmatpush.msra.mxu1 %v3175_v36  ;;  %1794 = vmatpush.msrb.mxu2 %v3377_v11  ;;  %v3798_v36 = vand.u32 4294901760, %v3450_v27  ;;  %v3498_v11 = vand.u32 4294901760, %v909_v18  ;;  %v3510_v8 = vand.u32 4294901760, %v908_v3 }
  0xf9   :  { %1630 = vmatpush.msrb.mxu0 %v3321_v9  ;;  %1830 = vmatpush.msrb.mxu3 %v3345_v12  ;;  %v824_v52 = vadd.f32 %v823_v28, %v791_v0 }
  0xfa   :  { %1912 = vmatpush.msra.mxu1 %v3183_v48  ;;  %1947 = vmatpush.msra.mxu2 %v3388_v7  ;;  %v3486_v48 = vand.u32 4294901760, %v910_v32  ;;  %v2008_v24 = vsub.f32 %v3450_v27, %v3798_v36  ;;  %v3519_v35 = vsub.f32 %v909_v18, %v3498_v11 }
  0xfb   :  { %1632 = vmatpush.msrb.mxu0 %v3333_v5  ;;  %1832 = vmatpush.msrb.mxu3 %v3357_v29  ;;  %v849_v36 = vadd.f32 %v848_v53, %v824_v52 }
  0xfc   :  { %1914 = vmatpush.msra.mxu1 %v3193_v58  ;;  %1949 = vmatpush.msra.mxu2 %v3398_v4  ;;  %v3799_v58 = vand.u32 4294901760, %v3454_v26  ;;  %v3508_v27 = vsub.f32 %v910_v32, %v3486_v48  ;;  %v3521_v32 = vand.u32 4294901760, %v907_v2  ;;  %v2043_v53 = vand.u32 4294901760, %v3519_v35 }
  0xfd   :  { %1992 = vmatpush.msra.mxu3 %v1991_v30  ;;  %1634 = vmatpush.msrb.mxu0 %v3345_v12 }
  0xfe   :  { %1797 = vmatmul.f32.vlgmr.msrb.gmra.mxu2 %v3424_v55  ;;  %1916 = vmatpush.msra.mxu1 %v3202_v38  ;;  %v2014_v30 = vsub.f32 %v3454_v26, %v3799_v58  ;;  %v3800_v38 = vand.u32 4294901760, %v3467_v42  ;;  %v906_v55 = vld [vmem:[#allocation8 + $0x198] sm:$0xff]  ;;  %v3801_v58 = vand.u32 4294901760, %v3191_v57  ;;  %v2037_v18 = vand.u32 4294901760, %v3508_v27 }
  0xff   :  { %1951 = vmatpush.msra.mxu2 %v3417_v43  ;;  %1998 = vmatpush.msra.mxu3 %v1997_v61  ;;  %v2009_v61 = vand.u32 4294901760, %v2008_v24  ;;  %v3534_v0 = vand.u32 4294901760, %v906_v55  ;;  %v3803_v57 = vand.u32 4294901760, %v3200_v51  ;;  %v3805_v51 = vand.u32 4294901760, %v3211_v41 }
 0x100   :  { %1636 = vmatpush.msrb.mxu0 %v3357_v29  ;;  %1836 = vmatmul.f32.vlgmr.msrb.gmra.mxu3 %v1639_v47  ;;  %v2020_v28 = vsub.f32 %v3467_v42, %v3800_v38  ;;  %v2015_v47 = vand.u32 4294901760, %v2014_v30  ;;  %v905_v38 = vld [vmem:[#allocation8 + $0x190] sm:$0xff]  ;;  %v3804_v30 = vand.u32 4294901760, %v3496_v34  ;;  %v3806_v41 = vand.u32 4294901760, %v3222_v16 }
 0x101   :  { %1642 = vmatmul.f32.vlgmr.msrb.gmra.mxu0 %v1641_v1  ;;  %1918 = vmatpush.msra.mxu1 %v3213_v56  ;;  %v3802_v56 = vand.u32 4294901760, %v3484_v54  ;;  %v3532_v1 = vsub.f32 %v908_v3, %v3510_v8  ;;  %v3545_v3 = vsub.f32 %v907_v2, %v3521_v32  ;;  %v3807_v16 = vand.u32 4294901760, %v3237_v62 }
 0x102   :  { %1843 = vmatpush.msra.mxu0 %v3801_v58  ;;  %1953 = vmatpush.msra.mxu2 %v3429_v6  ;;  %v2021_v52 = vand.u32 4294901760, %v2020_v28  ;;  %v3547_v58 = vand.u32 4294901760, %v905_v38 }
 0x103   :  { %2004 = vmatpush.msra.mxu3 %v2003_v39  ;;  %1743 = vmatmul.f32.vlgmr.msrb.gmra.mxu1 %v3406_v15  ;;  %v2026_v24 = vsub.f32 %v3484_v54, %v3802_v56  ;;  %v2032_v39 = vsub.f32 %v3496_v34, %v3804_v30  ;;  %v904_v56 = vld [vmem:[#allocation8 + $0x188] sm:$0xff]  ;;  %v2049_v2 = vand.u32 4294901760, %v3532_v1  ;;  %v903_v30 = vld [vmem:[#allocation8 + $0x180] sm:$0xff] }
 0x104   :  { %1847 = vmatpush.msra.mxu0 %v3803_v57  ;;  %1920 = vmatpush.msra.mxu1 %v3227_v49  ;;  %v854_v49 = vmax.f32 %v849_v36, 0.0  ;;  %v3558_v57 = vsub.f32 %v906_v55, %v3534_v0  ;;  %v3571_v55 = vsub.f32 %v905_v38, %v3547_v58 }
 0x105   :  { %1955 = vmatpush.msra.mxu2 %v3432_v33  ;;  %2010 = vmatpush.msra.mxu3 %v2009_v61  ;;  %v2027_v28 = vand.u32 4294901760, %v2026_v24  ;;  %v2038_v61 = vsub.f32 %v3508_v27, %v2037_v18  ;;  %v2033_v36 = vand.u32 4294901760, %v2032_v39  ;;  %v2055_v24 = vand.u32 4294901760, %v3545_v3 }
 0x106   :  { %1851 = vmatpush.msra.mxu0 %v3805_v51  ;;  %1922 = vmatpush.msra.mxu1 %v3239_v59  ;;  %v3563_v59 = vand.u32 4294901760, %v904_v56  ;;  %v3578_v51 = vand.u32 4294901760, %v903_v30  ;;  %v2050_v39 = vsub.f32 %v3532_v1, %v2049_v2  ;;  %v2061_v38 = vand.u32 4294901760, %v3558_v57 }
 0x107   :  { %1957 = vmatpush.msra.mxu2 %v3441_v25  ;;  %2016 = vmatpush.msra.mxu3 %v2015_v47  ;;  %v2044_v47 = vsub.f32 %v3519_v35, %v2043_v53 }
 0x108   :  { %1855 = vmatpush.msra.mxu0 %v3806_v41  ;;  %1924 = vmatpush.msra.mxu1 %v3250_v20  ;;  %v3576_v20 = vand.u32 4294901760, %v854_v49  ;;  %v3808_v41 = vand.u32 4294901760, %v3255_v44  ;;  %v3589_v62 = vsub.f32 %v904_v56, %v3563_v59  ;;  %v3809_v44 = vand.u32 4294901760, %v3265_v50 }
 0x109   :  { %1959 = vmatpush.msra.mxu2 %v3462_v46  ;;  %2022 = vmatpush.msra.mxu3 %v2021_v52  ;;  %v2039_v52 = vand.u32 4294901760, %v2038_v61  ;;  %v2067_v61 = vand.u32 4294901760, %v3571_v55  ;;  %v2051_v56 = vand.u32 4294901760, %v2050_v39  ;;  %v3812_v39 = vand.u32 4294901760, %v3307_v45 }
 0x10a   :  { %1859 = vmatpush.msra.mxu0 %v3807_v16  ;;  %1926 = vmatpush.msra.mxu1 %v3269_v14  ;;  %v2045_v14 = vand.u32 4294901760, %v2044_v47  ;;  %v3597_v16 = vsub.f32 %v854_v49, %v3576_v20  ;;  %v3810_v47 = vand.u32 4294901760, %v3278_v21  ;;  %v2073_v50 = vand.u32 4294901760, %v3589_v62 }
 0x10b   :  { %1961 = vmatpush.msra.mxu2 %v3473_v60  ;;  %2028 = vmatpush.msra.mxu3 %v2027_v28  ;;  %v2056_v28 = vsub.f32 %v3545_v3, %v2055_v24  ;;  %v2068_v49 = vsub.f32 %v3571_v55, %v2067_v61 }
 0x10c   :  { %1863 = vmatpush.msra.mxu0 %v3808_v41  ;;  %1928 = vmatpush.msra.mxu1 %v3284_v40  ;;  %v3603_v40 = vsub.f32 %v903_v30, %v3578_v51  ;;  %v1980_v30 = vand.u32 4294901760, %v3597_v16  ;;  %v2074_v41 = vsub.f32 %v3589_v62, %v2073_v50 }
 0x10d   :  { %1963 = vmatpush.msra.mxu2 %v3486_v48  ;;  %2034 = vmatpush.msra.mxu3 %v2033_v36  ;;  %v2062_v36 = vsub.f32 %v3558_v57, %v2061_v38 }
 0x10e   :  { %1867 = vmatpush.msra.mxu0 %v3809_v44  ;;  %1930 = vmatpush.msra.mxu1 %v3297_v17  ;;  %v2057_v17 = vand.u32 4294901760, %v2056_v28  ;;  %v2079_v21 = vand.u32 4294901760, %v3603_v40  ;;  %v2075_v28 = vand.u32 4294901760, %v2074_v41 }
 0x10f   :  { %1965 = vmatpush.msra.mxu2 %v3498_v11  ;;  %2040 = vmatpush.msra.mxu3 %v2039_v52  ;;  %v3811_v52 = vand.u32 4294901760, %v3295_v37  ;;  %v2069_v37 = vand.u32 4294901760, %v2068_v49 }
 0x110   :  { %1871 = vmatpush.msra.mxu0 %v3810_v47  ;;  %1932 = vmatpush.msra.mxu1 %v3309_v13  ;;  %v2063_v13 = vand.u32 4294901760, %v2062_v36  ;;  %v2080_v45 = vsub.f32 %v3603_v40, %v2079_v21  ;;  %v3821_v47 = vld [vmem:[#allocation17_spill] sm:$0xff] }
 0x111   :  { %1967 = vmatpush.msra.mxu2 %v3510_v8  ;;  %2046 = vmatpush.msra.mxu3 %v2045_v14  ;;  %v3813_v14 = vand.u32 4294901760, %v3319_v10  ;;  %v3815_v10 = vand.u32 4294901760, %v3343_v19  ;;  %v3818_v19 = vand.u32 4294901760, %v3420_v22 }
 0x112   :  { %1875 = vmatpush.msra.mxu0 %v3811_v52  ;;  %1934 = vmatpush.msra.mxu1 %v3321_v9  ;;  %v1981_v9 = vsub.f32 %v3597_v16, %v1980_v30  ;;  %v2081_v44 = vand.u32 4294901760, %v2080_v45  ;;  %v3825_v52 = vld [vmem:[#allocation18_spill] sm:$0xff] }
 0x113   :  { %1969 = vmatpush.msra.mxu2 %v3521_v32  ;;  %2052 = vmatpush.msra.mxu3 %v2051_v56  ;;  %v3819_v56 = vld [vmem:[#allocation15_spill] sm:$0xff] }
 0x114   :  { %1879 = vmatpush.msra.mxu0 %v3812_v39  ;;  %1936 = vmatpush.msra.mxu1 %v3333_v5  ;;  %v3814_v5 = vand.u32 4294901760, %v3331_v23  ;;  %v3816_v23 = vand.u32 4294901760, %v3409_v31  ;;  %v3820_v36 = vand.u32 4294901760, %v3819_v56 }
 0x115   :  { %1971 = vmatpush.msra.mxu2 %v3534_v0  ;;  %2058 = vmatpush.msra.mxu3 %v2057_v17  ;;  %v3822_v17 = vand.u32 4294901760, %v3821_v47 }
 0x116   :  { %1883 = vmatpush.msra.mxu0 %v3813_v14  ;;  %1938 = vmatpush.msra.mxu1 %v3345_v12  ;;  %v1982_v12 = vand.u32 4294901760, %v1981_v9 }
 0x117   :  { %1973 = vmatpush.msra.mxu2 %v3547_v58  ;;  %2064 = vmatpush.msra.mxu3 %v2063_v13  ;;  %v3826_v13 = vand.u32 4294901760, %v3825_v52 }
 0x118   :  { %1887 = vmatpush.msra.mxu0 %v3814_v5  ;;  %1940 = vmatpush.msra.mxu1 %v3357_v29  ;;  %v3817_v29 = vand.u32 4294901760, %v3355_v63  ;;  %v3823_v63 = vld [vmem:[#allocation16_spill] sm:$0xff] }
 0x119   :  { %1975 = vmatpush.msra.mxu2 %v3563_v59  ;;  %2070 = vmatpush.msra.mxu3 %v2069_v37  ;;  %v3824_v49 = vand.u32 4294901760, %v3823_v63 }
 0x11a   :  { %1942 = vmatmul.f32.vlgmr.msra.gmra.mxu1 %v3406_v15  ;;  %1891 = vmatpush.msra.mxu0 %v3815_v10 }
 0x11b   :  { %2143 = vmatpush.msrb.mxu1 %v3388_v7  ;;  %1977 = vmatpush.msra.mxu2 %v3578_v51 }
 0x11c   :  { %2076 = vmatpush.msra.mxu3 %v2075_v28  ;;  %1895 = vmatpush.msra.mxu0 %v3817_v29 }
 0x11d   :  { %2184 = vmatpush.msrb.mxu2 %v3816_v23  ;;  %2145 = vmatpush.msrb.mxu1 %v3398_v4 }
 0x11e   :  { %1983 = vmatmul.f32.vlgmr.msra.gmra.mxu2 %v1982_v12  ;;  %2082 = vmatpush.msra.mxu3 %v2081_v44 }
 0x11f   :  { %2084 = vmatmul.f32.vlgmr.msra.gmra.mxu3 %v3576_v20  ;;  %2147 = vmatpush.msrb.mxu1 %v3417_v43 }
 0x120   :  { %2188 = vmatpush.msrb.mxu2 %v3818_v19  ;;  %2251 = vmatpush.msrb.mxu3 %v3388_v7  ;;  %v3827_v7 = vand.u32 4294901760, %v3454_v26 }
 0x121   :  { %1899 = vmatpush.msra.mxu0 %v3820_v36  ;;  %2149 = vmatpush.msrb.mxu1 %v3429_v6 }
 0x122   :  { %2192 = vmatpush.msrb.mxu2 %v3822_v17  ;;  %2253 = vmatpush.msrb.mxu3 %v3398_v4  ;;  %v3828_v4 = vand.u32 4294901760, %v3467_v42 }
 0x123   :  { %1903 = vmatpush.msra.mxu0 %v3824_v49  ;;  %2151 = vmatpush.msrb.mxu1 %v3432_v33 }
 0x124   :  { %1905 = vmatmul.f32.vlgmr.msra.gmra.mxu0 %v3406_v15  ;;  %2196 = vmatpush.msrb.mxu2 %v3826_v13 }
 0x125   :  { %2090 = vmatpush.msrb.mxu0 %v3409_v31  ;;  %2255 = vmatpush.msrb.mxu3 %v3417_v43  ;;  %v3829_v43 = vand.u32 4294901760, %v3484_v54 }
 0x126   :  { %2153 = vmatpush.msrb.mxu1 %v3441_v25  ;;  %2200 = vmatpush.msrb.mxu2 %v3827_v7 }
 0x127   :  { %2093 = vmatpush.msrb.mxu0 %v3420_v22  ;;  %2257 = vmatpush.msrb.mxu3 %v3429_v6  ;;  %v3830_v22 = vand.u32 4294901760, %v3496_v34 }
 0x128   :  { %2155 = vmatpush.msrb.mxu1 %v3462_v46  ;;  %2204 = vmatpush.msrb.mxu2 %v3828_v4 }
 0x129   :  { %2096 = vmatpush.msrb.mxu0 %v3821_v47  ;;  %2259 = vmatpush.msrb.mxu3 %v3432_v33 }
 0x12a   :  { %2157 = vmatpush.msrb.mxu1 %v3473_v60  ;;  %2208 = vmatpush.msrb.mxu2 %v3829_v43 }
 0x12b   :  { %2099 = vmatpush.msrb.mxu0 %v3825_v52  ;;  %2261 = vmatpush.msrb.mxu3 %v3441_v25 }
 0x12c   :  { %2159 = vmatpush.msrb.mxu1 %v3486_v48  ;;  %2212 = vmatpush.msrb.mxu2 %v3830_v22 }
 0x12d   :  { %2102 = vmatpush.msrb.mxu0 %v3454_v26  ;;  %2263 = vmatpush.msrb.mxu3 %v3462_v46 }
 0x12e   :  { %2161 = vmatpush.msrb.mxu1 %v3498_v11  ;;  %2216 = vmatpush.msrb.mxu2 %v2037_v18 }
 0x12f   :  { %2105 = vmatpush.msrb.mxu0 %v3467_v42  ;;  %2265 = vmatpush.msrb.mxu3 %v3473_v60 }
 0x130   :  { %2163 = vmatpush.msrb.mxu1 %v3510_v8  ;;  %2220 = vmatpush.msrb.mxu2 %v2043_v53 }
 0x131   :  { %2108 = vmatpush.msrb.mxu0 %v3484_v54  ;;  %2267 = vmatpush.msrb.mxu3 %v3486_v48  ;;  %v2316_v54 = vld [vmem:[%s3751_s4] ss:$0 sm:$0xff]  ;;  %s2453_s4 = smov [#allocation10]  }
 0x132   :  { %2165 = vmatpush.msrb.mxu1 %v3521_v32  ;;  %2224 = vmatpush.msrb.mxu2 %v2049_v2  ;;  %s2293_s15 = sshll.u32 %s2453_s4, 4  ;;  %s2294_s15 = int_to_ptr.vmem [resolvable:$true] %s2293_s15 }
 0x133   :  { %2111 = vmatpush.msrb.mxu0 %v3496_v34  ;;  %2269 = vmatpush.msrb.mxu3 %v3498_v11  ;;  %v1062_v11 = vpop.f32.mrf.mxu1 }
 0x134   :  { %2167 = vmatpush.msrb.mxu1 %v3534_v0  ;;  %2228 = vmatpush.msrb.mxu2 %v2055_v24 }
 0x135   :  { %2114 = vmatpush.msrb.mxu0 %v3508_v27  ;;  %2271 = vmatpush.msrb.mxu3 %v3510_v8 }
 0x136   :  { %2169 = vmatpush.msrb.mxu1 %v3547_v58  ;;  %2232 = vmatpush.msrb.mxu2 %v2061_v38 }
 0x137   :  { %2117 = vmatpush.msrb.mxu0 %v3519_v35  ;;  %2273 = vmatpush.msrb.mxu3 %v3521_v32 }
 0x138   :  { %2171 = vmatpush.msrb.mxu1 %v3563_v59  ;;  %2236 = vmatpush.msrb.mxu2 %v2067_v61  ;;  %v961_v60 = vpop.f32.mrf.mxu0  ;;  %v1116_v31 = vpop.f32.mrf.mxu2 }
 0x139   :  { %2120 = vmatpush.msrb.mxu0 %v3532_v1  ;;  %2275 = vmatpush.msrb.mxu3 %v3534_v0  ;;  %v962_v8 = vadd.f32 %v2316_v54, %v961_v60 }
 0x13a   :  { %2173 = vmatpush.msrb.mxu1 %v3578_v51  ;;  %2240 = vmatpush.msrb.mxu2 %v2073_v50  ;;  %v1155_v33 = vpop.f32.mrf.mxu3 }
 0x13b   :  { %2123 = vmatpush.msrb.mxu0 %v3545_v3  ;;  %2277 = vmatpush.msrb.mxu3 %v3547_v58  ;;  %v1063_v15 = vadd.f32 %v1062_v11, %v962_v8  ;;  %v1261_v46 = vpop.f32.mrf.mxu1 }
 0x13c   :  { %2177 = vmatmul.f32.vlgmr.msrb.gmra.mxu1 %v1980_v30  ;;  %2244 = vmatpush.msrb.mxu2 %v2079_v21 }
 0x13d   :  { %2126 = vmatpush.msrb.mxu0 %v3558_v57  ;;  %2279 = vmatpush.msrb.mxu3 %v3563_v59  ;;  %v1117_v6 = vadd.f32 %v1116_v31, %v1063_v15 }
 0x13e   :  { %2246 = vmatmul.f32.vlgmr.msrb.gmra.mxu2 %v3576_v20 }
 0x13f   :  { %2129 = vmatpush.msrb.mxu0 %v3571_v55  ;;  %2281 = vmatpush.msrb.mxu3 %v3578_v51  ;;  %v1156_v25 = vadd.f32 %v1155_v33, %v1117_v6 }
 0x140   :  { %2283 = vmatmul.f32.vlgmr.msrb.gmra.mxu3 %v3576_v20 }
 0x141   :  { %2132 = vmatpush.msrb.mxu0 %v3589_v62  ;;  %v1224_v27 = vpop.f32.mrf.mxu0 }
 0x142   :  { %v1225_v26 = vadd.f32 %v1224_v27, %v1156_v25 }
 0x143   :  { %2135 = vmatpush.msrb.mxu0 %v3603_v40 }
 0x144   :  { %2138 = vmatmul.f32.vlgmr.msrb.gmra.mxu0 %v3597_v16  ;;  %v1262_v48 = vadd.f32 %v1261_v46, %v1225_v26 }
 0x14c   :  { %v1302_v42 = vpop.f32.mrf.mxu2 }
 0x14d   :  { %v1303_v34 = vadd.f32 %v1302_v42, %v1262_v48 }
 0x14f   :  { %v1403_v0 = vpop.f32.mrf.mxu3 }
 0x150   :  { %v1404_v32 = vadd.f32 %v1403_v0, %v1303_v34 }
 0x153   :  { %v1496_v1 = vpop.f32.mrf.mxu1 }
 0x15b   :  { %v1565_v3 = vpop.f32.mrf.mxu2 }
 0x15d   :  { %v1457_v35 = vpop.f32.mrf.mxu0 }
 0x15e   :  { %v1458_v18 = vadd.f32 %v1457_v35, %v1404_v32  ;;  %v1602_v2 = vpop.f32.mrf.mxu3 }
 0x160   :  { %v1497_v53 = vadd.f32 %v1496_v1, %v1458_v18 }
 0x162   :  { %v1566_v58 = vadd.f32 %v1565_v3, %v1497_v53 }
 0x164   :  { %v1603_v59 = vadd.f32 %v1602_v2, %v1566_v58 }
 0x17e   :  { %v1643_v57 = vpop.f32.mrf.mxu0 }
 0x17f   :  { %v1644_v24 = vadd.f32 %v1643_v57, %v1603_v59 }
 0x180   :  { %v1744_v55 = vpop.f32.mrf.mxu1 }
 0x181   :  { %v1745_v20 = vadd.f32 %v1744_v55, %v1644_v24  ;;  %v1798_v51 = vpop.f32.mrf.mxu2 }
 0x183   :  { %v1799_v38 = vadd.f32 %v1798_v51, %v1745_v20  ;;  %v1837_v62 = vpop.f32.mrf.mxu3 }
 0x185   :  { %v1838_v16 = vadd.f32 %v1837_v62, %v1799_v38 }
 0x197   :  { %v1943_v50 = vpop.f32.mrf.mxu1 }
 0x1a1   :  { %v1906_v61 = vpop.f32.mrf.mxu0  ;;  %v1984_v21 = vpop.f32.mrf.mxu2 }
 0x1a2   :  { %v1907_v40 = vadd.f32 %v1906_v61, %v1838_v16  ;;  %v2085_v41 = vpop.f32.mrf.mxu3 }
 0x1a4   :  { %v1944_v30 = vadd.f32 %v1943_v50, %v1907_v40 }
 0x1a6   :  { %v1985_v39 = vadd.f32 %v1984_v21, %v1944_v30 }
 0x1a8   :  { %v2086_v37 = vadd.f32 %v2085_v41, %v1985_v39 }
 0x1b9   :  { %v2178_v45 = vpop.f32.mrf.mxu1 }
 0x1c1   :  { %v2139_v9 = vpop.f32.mrf.mxu0  ;;  %v2247_v28 = vpop.f32.mrf.mxu2 }
 0x1c2   :  { %v2140_v14 = vadd.f32 %v2139_v9, %v2086_v37 }
 0x1c3   :  { %v2284_v12 = vpop.f32.mrf.mxu3 }
 0x1c4   :  { %v2179_v5 = vadd.f32 %v2178_v45, %v2140_v14 }
 0x1c6   :  { %v2248_v10 = vadd.f32 %v2247_v28, %v2179_v5 }
 0x1c8   :  { %v2285_v44 = vadd.f32 %v2284_v12, %v2248_v10 }
 0x1ca   :  { %2287 = vst [vmem:[#allocation10] sm:$0xff] %v2285_v44 }
 0x1cb   :  { %2298 = dma.vmem_to_hbm [thread:$0]  %s2294_s15, 128, %s2296_s18, [#allocation4]  }
 0x1cc   :  { %2443 = dma.done.wait [#allocation4], 128  }
 0x1cd   :  { %2444 = vsyncadd [#allocation4], 4294967168 }
 0x1ce   :  { %2303 = vsyncpa [#allocation3], 1 }
 0x1cf   :  { %2304 = vsyncpa [#allocation6], 1 }
 0x1d0   :  { %2305 = vsyncpa [#allocation9], 1 }
 0x1d1   :  { %2306 = vsyncpa [#allocation4], 1 }

</bundles_post_ra>
